<compile_context>
chip_gen: v6e
topology: v6e:2x2x1
jax: 0.10.0
libtpu: 0.0.40
codegen_flags: <defaults>
</compile_context>

<pallas_src>
import jax
import jax.numpy as jnp
from jax.experimental import pallas as pl
from jax.experimental.pallas import tpu as pltpu

HIDDEN = 512     # fixed by the PyTorch module definition
R_PAD = 128      # pad num_regions to a full lane width (lane-dense stores/reductions)
NEG_INF = -1e9   # padded-lane logit; exp(-1e9) underflows to exactly 0 in f32


def _round_up(x, m):
    return ((x + m - 1) // m) * m


def _make_generator_kernel(num_regions):
    def kernel(z_ref, w1_ref, w2_ref, b2_ref, w3_ref, b3_ref, w4_ref, b4_ref,
               g_ref, probs_ref, onehot_ref):
        f32, bf16 = jnp.float32, jnp.bfloat16

        # ---- MLP hot path: bf16 operands on the MXU, f32 accumulation.
        # Layer 1 bias is folded into w1 (ones-column in the K padding), so no epilogue add.
        h = jnp.dot(z_ref[...], w1_ref[...], preferred_element_type=f32)
        h = jnp.maximum(h.astype(bf16), 0)      # bf16 ReLU == downcast(relu(f32)); half the vregs
        h = jnp.dot(h, w2_ref[...], preferred_element_type=f32) + b2_ref[...]
        h = jnp.maximum(h.astype(bf16), 0)
        h = jnp.dot(h, w3_ref[...], preferred_element_type=f32) + b3_ref[...]
        h = jnp.maximum(h.astype(bf16), 0)
        logits = jnp.dot(h, w4_ref[...], preferred_element_type=f32) + b4_ref[...]
        logits = jnp.clip(logits, -10.0, 10.0)  # torch.clamp(-10, 10)

        # Mask padded region lanes AFTER the clamp (clamp would pull -1e9 back up to -10).
        rid = jax.lax.broadcasted_iota(jnp.int32, logits.shape, 1)
        logits = jnp.where(rid < num_regions, logits, NEG_INF)

        # ---- softmax(logits, dim=-1).
        # NOTE: no max-subtraction is safe ONLY because logits were clipped to [-10, 10] right
        # above (exp cannot overflow); padded lanes contribute exp(-1e9) == 0 to the sum.
        e = jnp.exp(logits)
        denom = jnp.sum(e, axis=-1, keepdims=True)
        probs_ref[...] = e * pl.reciprocal(denom, approx=True)   # EUP slot, ~free in this epilogue

        # ---- gumbel_softmax(logits, tau=1, hard=True): forward value is
        # one_hot(argmax(logits + gumbel_noise)), first-index tie break.
        # Single XLU reduction: build a monotone int32 key from the f32 bit pattern and pack the
        # reversed lane index into the low 7 bits (comparison quantized to the top 25 bits of y;
        # ties within that window resolve to the first index, matching torch.argmax).
        y = logits + g_ref[...]
        yb = pltpu.bitcast(y, jnp.int32)
        key = yb ^ jnp.where(yb < 0, jnp.int32(0x7FFFFFFF), jnp.int32(0))
        packed = (key & jnp.int32(-R_PAD)) | (jnp.int32(R_PAD - 1) - rid)
        best = jnp.max(packed, axis=-1, keepdims=True)
        first_idx = jnp.int32(R_PAD - 1) - (best & jnp.int32(R_PAD - 1))
        onehot_ref[...] = (rid == first_idx).astype(f32)
        # TODO(synk): forward-only; straight-through gradient of hard gumbel-softmax not implemented.

    return kernel


def prepare_params(params, num_regions, d_in):
    """One-time weight pad/cast (hoisted out of the per-call wrapper).

    Builds bf16 MXU weights with lane/tile-friendly padding and folds b1 into w1 via an extra
    'ones' input column.  Biases b2/b3/b4 stay f32 (added after f32 accumulation).
    """
    bf16, f32 = jnp.bfloat16, jnp.float32
    K_PAD = _round_up(d_in + 1, 128)   # +1 column carries the folded b1

    w1 = jnp.zeros((K_PAD, HIDDEN), bf16)
    w1 = w1.at[:d_in, :].set(params["w1"].astype(bf16))
    w1 = w1.at[d_in, :].set(params["b1"].reshape(-1).astype(bf16))    # folded bias row

    w4 = jnp.zeros((HIDDEN, R_PAD), bf16).at[:, :num_regions].set(params["w4"].astype(bf16))
    b4 = jnp.zeros((1, R_PAD), f32).at[:, :num_regions].set(params["b4"].astype(f32))

    return {
        "w1": w1,
        "w2": params["w2"].astype(bf16),
        "b2": params["b2"].reshape(1, HIDDEN).astype(f32),
        "w3": params["w3"].astype(bf16),
        "b3": params["b3"].reshape(1, HIDDEN).astype(f32),
        "w4": w4,
        "b4": b4,
    }


def generator_forward(z, quant_points, prep, gumbel_noise):
    B, d_in = z.shape
    _, R, D = quant_points.shape
    assert d_in == 1 + R * D
    assert R <= R_PAD

    f32, bf16 = jnp.float32, jnp.bfloat16
    K_PAD = prep["w1"].shape[0]
    assert K_PAD >= d_in + 1

    # Batch tile: big enough to amortize per-grid-step overhead (v6e/v7x), multiple of 16 (bf16
    # sublane pack).  If the whole (large-enough) batch fits one tile, split it so the grid has
    # >=2 steps and dimension_semantics=("parallel",) can shard across both v7x TensorCores.
    TB = min(512, _round_up(B, 16))
    B_pad = _round_up(B, TB)
    if B_pad // TB == 1 and TB % 32 == 0:
        TB = TB // 2

    # Per-call layout plumbing (cheap: only the batch-sized operands).
    z_p = jnp.zeros((B_pad, K_PAD), bf16).at[:B, :d_in].set(z.astype(bf16))
    z_p = z_p.at[:B, d_in].set(1.0)                        # ones-column -> folds b1 into w1
    g_p = jnp.zeros((B_pad, R_PAD), f32).at[:B, :R].set(gumbel_noise.astype(f32))

    const = lambda i: (0, 0)   # weights/biases: VMEM-resident across grid steps
    row = lambda i: (i, 0)     # batch-tiled operands
    # NOTE: constant specs could use pipeline_mode=pl.Buffered(1) to drop their second (dead)
    # VMEM buffer (~1.3 MiB); kept at the default for lowering robustness.

    kernel = pl.pallas_call(
        _make_generator_kernel(R),
        out_shape=(jax.ShapeDtypeStruct((B_pad, R_PAD), f32),   # padded probs
                   jax.ShapeDtypeStruct((B_pad, R_PAD), f32)),  # padded one-hot
        grid_spec=pltpu.PrefetchScalarGridSpec(
            num_scalar_prefetch=0,
            grid=(B_pad // TB,),
            in_specs=[
                pl.BlockSpec((TB, K_PAD), row),         # z (with ones-column)
                pl.BlockSpec((K_PAD, HIDDEN), const),   # w1 (b1 folded)
                pl.BlockSpec((HIDDEN, HIDDEN), const),  # w2
                pl.BlockSpec((1, HIDDEN), const),       # b2
                pl.BlockSpec((HIDDEN, HIDDEN), const),  # w3
                pl.BlockSpec((1, HIDDEN), const),       # b3
                pl.BlockSpec((HIDDEN, R_PAD), const),   # w4
                pl.BlockSpec((1, R_PAD), const),        # b4
                pl.BlockSpec((TB, R_PAD), row),         # gumbel noise
            ],
            out_specs=(pl.BlockSpec((TB, R_PAD), row),
                       pl.BlockSpec((TB, R_PAD), row)),
        ),
        compiler_params=pltpu.CompilerParams(
            dimension_semantics=("parallel",),           # megacore-shard the batch grid (v7x)
            vmem_limit_bytes=32 * 1024 * 1024),          # explicit: TB=512 safe on v5e too
    )
    probs_p, onehot_p = kernel(z_p, prep["w1"], prep["w2"], prep["b2"],
                               prep["w3"], prep["b3"], prep["w4"], prep["b4"], g_p)

    probs = probs_p[:B, :R]
    onehot = onehot_p[:B, :R]
    # Tiny [B, D] quant-point selection: lane-hostile (D=4), so done in plain JAX.
    outputs = jnp.einsum("br,brd->bd", onehot, quant_points)
    return outputs, probs


def init_params(key, dimension, num_regions):
    """Deterministic synthetic init mirroring nn.Linear default (U(-1/sqrt(fan_in), ...))."""
    d_in = 1 + num_regions * dimension
    layer_dims = [(d_in, HIDDEN), (HIDDEN, HIDDEN), (HIDDEN, HIDDEN), (HIDDEN, num_regions)]
    params = {}
    for i, (fi, fo) in enumerate(layer_dims, start=1):
        key, kw, kb = jax.random.split(key, 3)
        bound = 1.0 / (fi ** 0.5)
        params[f"w{i}"] = jax.random.uniform(kw, (fi, fo), jnp.float32, -bound, bound)
        params[f"b{i}"] = jax.random.uniform(kb, (1, fo), jnp.float32, -bound, bound)
    return params


def _reference_forward(z, quant_points, params, gumbel_noise):
    """Pure-JAX reference mirroring the kernel's precision choices (bf16 matmul operands,
    f32 accumulation; layer-1 bias folded in bf16)."""
    f32, bf16 = jnp.float32, jnp.bfloat16

    def lin(x, w, b, bias_bf16=False):
        xb = x.astype(bf16).astype(f32)
        wb = w.astype(bf16).astype(f32)
        bb = b.astype(bf16).astype(f32) if bias_bf16 else b.astype(f32)
        return jnp.dot(xb, wb, precision=jax.lax.Precision.HIGHEST) + bb

    h = jnp.maximum(lin(z, params["w1"], params["b1"], bias_bf16=True), 0.0)
    h = jnp.maximum(lin(h, params["w2"], params["b2"]), 0.0)
    h = jnp.maximum(lin(h, params["w3"], params["b3"]), 0.0)
    logits = jnp.clip(lin(h, params["w4"], params["b4"]), -10.0, 10.0)
    probs = jax.nn.softmax(logits, axis=-1)
    y = logits + gumbel_noise
    onehot = jax.nn.one_hot(jnp.argmax(y, axis=-1), y.shape[-1], dtype=f32)
    outputs = jnp.sum(onehot[:, :, None] * quant_points, axis=1)
    return outputs, probs


if __name__ == "__main__":
    dimension, num_regions, batch = 4, 8, 2
    d_in = 1 + num_regions * dimension

    key = jax.random.PRNGKey(0)
    kp, kz, kq, kg = jax.random.split(key, 4)
    params = init_params(kp, dimension, num_regions)
    prep = prepare_params(params, num_regions, d_in)   # one-time pad/cast, reused every call

    z = jax.random.normal(kz, (batch, d_in), jnp.float32)
    quant_points = jax.random.normal(kq, (batch, num_regions, dimension), jnp.float32)
    # Gumbel noise sampled in the wrapper (deterministic); torch samples it inside gumbel_softmax.
    u = jax.random.uniform(kg, (batch, num_regions), jnp.float32, 1e-10, 1.0)
    gumbel_noise = -jnp.log(-jnp.log(u))

    outputs, probs = generator_forward(z, quant_points, prep, gumbel_noise)
    jax.block_until_ready((outputs, probs))

    ref_out, ref_probs = _reference_forward(z, quant_points, params, gumbel_noise)
    assert outputs.shape == (batch, dimension) and probs.shape == (batch, num_regions)
    # probs tolerance accounts for the EUP approximate reciprocal in the softmax denominator.
    assert jnp.allclose(probs, ref_probs, atol=2e-3), "probs mismatch"
    assert jnp.allclose(outputs, ref_out, atol=1e-4), "outputs mismatch"

    print("KERNEL_OK")
</pallas_src>

<mosaic_0001>
module attributes {stable_mosaic.version = 11 : i64} {
  func.func @kernel(%arg0: i32, %arg1: memref<16x128xbf16, #tpu.memory_space<vmem>>, %arg2: memref<128x512xbf16, #tpu.memory_space<vmem>>, %arg3: memref<512x512xbf16, #tpu.memory_space<vmem>>, %arg4: memref<1x512xf32, #tpu.memory_space<vmem>>, %arg5: memref<512x512xbf16, #tpu.memory_space<vmem>>, %arg6: memref<1x512xf32, #tpu.memory_space<vmem>>, %arg7: memref<512x128xbf16, #tpu.memory_space<vmem>>, %arg8: memref<1x128xf32, #tpu.memory_space<vmem>>, %arg9: memref<16x128xf32, #tpu.memory_space<vmem>>, %arg10: memref<16x128xf32, #tpu.memory_space<vmem>>, %arg11: memref<16x128xf32, #tpu.memory_space<vmem>>) attributes {dimension_semantics = [#tpu.dimension_semantics<parallel>], iteration_bounds = array<i64: 1>, scalar_prefetch = 0 : i64, scratch_operands = 0 : i64, tpu.core_type = #tpu.core_type<tc>, window_params = [{transform_indices = @transform_0, window_bounds = array<i64: 16, 128>}, {pipeline_mode = #tpu.pipeline_mode<synchronous>, transform_indices = @transform_1, window_bounds = array<i64: 128, 512>}, {pipeline_mode = #tpu.pipeline_mode<synchronous>, transform_indices = @transform_2, window_bounds = array<i64: 512, 512>}, {pipeline_mode = #tpu.pipeline_mode<synchronous>, transform_indices = @transform_3, window_bounds = array<i64: 1, 512>}, {pipeline_mode = #tpu.pipeline_mode<synchronous>, transform_indices = @transform_4, window_bounds = array<i64: 512, 512>}, {pipeline_mode = #tpu.pipeline_mode<synchronous>, transform_indices = @transform_5, window_bounds = array<i64: 1, 512>}, {pipeline_mode = #tpu.pipeline_mode<synchronous>, transform_indices = @transform_6, window_bounds = array<i64: 512, 128>}, {pipeline_mode = #tpu.pipeline_mode<synchronous>, transform_indices = @transform_7, window_bounds = array<i64: 1, 128>}, {transform_indices = @transform_8, window_bounds = array<i64: 16, 128>}, {transform_indices = @transform_9, window_bounds = array<i64: 16, 128>}, {transform_indices = @transform_10, window_bounds = array<i64: 16, 128>}]} {
    %c0 = arith.constant 0 : index
    %c0_0 = arith.constant 0 : index
    %0 = vector.load %arg1[%c0, %c0_0] : memref<16x128xbf16, #tpu.memory_space<vmem>>, vector<16x128xbf16>
    %c0_1 = arith.constant 0 : index
    %c0_2 = arith.constant 0 : index
    %1 = vector.load %arg2[%c0_1, %c0_2] : memref<128x512xbf16, #tpu.memory_space<vmem>>, vector<128x512xbf16>
    %cst = arith.constant dense<0.000000e+00> : vector<16x512xf32>
    %2 = tpu.matmul %0, %1, %cst {dimension_numbers = #tpu.dot_dimension_numbers<[1], [0], [0], [1], [0, 0, 1, 1], [], []>} : vector<16x128xbf16>, vector<128x512xbf16>, vector<16x512xf32> -> vector<16x512xf32>
    %3 = arith.truncf %2 : vector<16x512xf32> to vector<16x512xbf16>
    %cst_3 = arith.constant 0.000000e+00 : bf16
    %4 = vector.broadcast %cst_3 : bf16 to vector<16x512xbf16>
    %5 = arith.maximumf %3, %4 : vector<16x512xbf16>
    %c0_4 = arith.constant 0 : index
    %c0_5 = arith.constant 0 : index
    %6 = vector.load %arg3[%c0_4, %c0_5] : memref<512x512xbf16, #tpu.memory_space<vmem>>, vector<512x512xbf16>
    %cst_6 = arith.constant dense<0.000000e+00> : vector<16x512xf32>
    %7 = tpu.matmul %5, %6, %cst_6 {dimension_numbers = #tpu.dot_dimension_numbers<[1], [0], [0], [1], [0, 0, 1, 1], [], []>} : vector<16x512xbf16>, vector<512x512xbf16>, vector<16x512xf32> -> vector<16x512xf32>
    %c0_7 = arith.constant 0 : index
    %c0_8 = arith.constant 0 : index
    %8 = vector.load %arg4[%c0_7, %c0_8] : memref<1x512xf32, #tpu.memory_space<vmem>>, vector<1x512xf32>
    %9 = vector.broadcast %8 : vector<1x512xf32> to vector<16x512xf32>
    %10 = arith.addf %7, %9 : vector<16x512xf32>
    %11 = arith.truncf %10 : vector<16x512xf32> to vector<16x512xbf16>
    %cst_9 = arith.constant 0.000000e+00 : bf16
    %12 = vector.broadcast %cst_9 : bf16 to vector<16x512xbf16>
    %13 = arith.maximumf %11, %12 : vector<16x512xbf16>
    %c0_10 = arith.constant 0 : index
    %c0_11 = arith.constant 0 : index
    %14 = vector.load %arg5[%c0_10, %c0_11] : memref<512x512xbf16, #tpu.memory_space<vmem>>, vector<512x512xbf16>
    %cst_12 = arith.constant dense<0.000000e+00> : vector<16x512xf32>
    %15 = tpu.matmul %13, %14, %cst_12 {dimension_numbers = #tpu.dot_dimension_numbers<[1], [0], [0], [1], [0, 0, 1, 1], [], []>} : vector<16x512xbf16>, vector<512x512xbf16>, vector<16x512xf32> -> vector<16x512xf32>
    %c0_13 = arith.constant 0 : index
    %c0_14 = arith.constant 0 : index
    %16 = vector.load %arg6[%c0_13, %c0_14] : memref<1x512xf32, #tpu.memory_space<vmem>>, vector<1x512xf32>
    %17 = vector.broadcast %16 : vector<1x512xf32> to vector<16x512xf32>
    %18 = arith.addf %15, %17 : vector<16x512xf32>
    %19 = arith.truncf %18 : vector<16x512xf32> to vector<16x512xbf16>
    %cst_15 = arith.constant 0.000000e+00 : bf16
    %20 = vector.broadcast %cst_15 : bf16 to vector<16x512xbf16>
    %21 = arith.maximumf %19, %20 : vector<16x512xbf16>
    %c0_16 = arith.constant 0 : index
    %c0_17 = arith.constant 0 : index
    %22 = vector.load %arg7[%c0_16, %c0_17] : memref<512x128xbf16, #tpu.memory_space<vmem>>, vector<512x128xbf16>
    %cst_18 = arith.constant dense<0.000000e+00> : vector<16x128xf32>
    %23 = tpu.matmul %21, %22, %cst_18 {dimension_numbers = #tpu.dot_dimension_numbers<[1], [0], [0], [1], [0, 0, 1, 1], [], []>} : vector<16x512xbf16>, vector<512x128xbf16>, vector<16x128xf32> -> vector<16x128xf32>
    %c0_19 = arith.constant 0 : index
    %c0_20 = arith.constant 0 : index
    %24 = vector.load %arg8[%c0_19, %c0_20] : memref<1x128xf32, #tpu.memory_space<vmem>>, vector<1x128xf32>
    %25 = vector.broadcast %24 : vector<1x128xf32> to vector<16x128xf32>
    %26 = arith.addf %23, %25 : vector<16x128xf32>
    %cst_21 = arith.constant -1.000000e+01 : f32
    %cst_22 = arith.constant 1.000000e+01 : f32
    %27 = vector.broadcast %cst_21 : f32 to vector<16x128xf32>
    %28 = arith.maximumf %27, %26 : vector<16x128xf32>
    %29 = vector.broadcast %cst_22 : f32 to vector<16x128xf32>
    %30 = arith.minimumf %29, %28 : vector<16x128xf32>
    %31 = tpu.iota {dimensions = array<i32: 1>} : vector<16x128xi32>
    %c8_i32 = arith.constant 8 : i32
    %32 = vector.broadcast %c8_i32 : i32 to vector<16x128xi32>
    %33 = arith.cmpi slt, %31, %32 : vector<16x128xi32>
    %cst_23 = arith.constant -1.000000e+09 : f32
    %34 = vector.broadcast %cst_23 : f32 to vector<16x128xf32>
    %35 = arith.select %33, %30, %34 : vector<16x128xi1>, vector<16x128xf32>
    %36 = math.exp %35 : vector<16x128xf32>
    %cst_24 = arith.constant dense<0.000000e+00> : vector<16xf32>
    %37 = vector.multi_reduction <add>, %36, %cst_24 [1] : vector<16x128xf32> to vector<16xf32>
    %38 = vector.shape_cast %37 : vector<16xf32> to vector<16x1xf32>
    %39 = tpu.reciprocal %38 {approx = true} : vector<16x1xf32> -> vector<16x1xf32>
    %40 = vector.broadcast %39 : vector<16x1xf32> to vector<16x128xf32>
    %41 = arith.mulf %36, %40 : vector<16x128xf32>
    %c0_25 = arith.constant 0 : index
    %c0_26 = arith.constant 0 : index
    %42 = vector.load %arg10[%c0_25, %c0_26] : memref<16x128xf32, #tpu.memory_space<vmem>>, vector<16x128xf32>
    tpu.vector_store %arg10[%c0_25, %c0_26], %41 {strides = array<i32>} : memref<16x128xf32, #tpu.memory_space<vmem>>, vector<16x128xf32>,
    %c0_27 = arith.constant 0 : index
    %c0_28 = arith.constant 0 : index
    %43 = vector.load %arg9[%c0_27, %c0_28] : memref<16x128xf32, #tpu.memory_space<vmem>>, vector<16x128xf32>
    %44 = arith.addf %35, %43 : vector<16x128xf32>
    %45 = tpu.bitcast %44 : vector<16x128xf32> -> vector<16x128xi32>
    %c0_i32 = arith.constant 0 : i32
    %46 = vector.broadcast %c0_i32 : i32 to vector<16x128xi32>
    %47 = arith.cmpi slt, %45, %46 : vector<16x128xi32>
    %c2147483647_i32 = arith.constant 2147483647 : i32
    %c0_i32_29 = arith.constant 0 : i32
    %48 = vector.broadcast %c2147483647_i32 : i32 to vector<16x128xi32>
    %49 = vector.broadcast %c0_i32_29 : i32 to vector<16x128xi32>
    %50 = arith.select %47, %48, %49 : vector<16x128xi1>, vector<16x128xi32>
    %51 = arith.xori %45, %50 : vector<16x128xi32>
    %c-128_i32 = arith.constant -128 : i32
    %52 = vector.broadcast %c-128_i32 : i32 to vector<16x128xi32>
    %53 = arith.andi %51, %52 : vector<16x128xi32>
    %c127_i32 = arith.constant 127 : i32
    %54 = vector.broadcast %c127_i32 : i32 to vector<16x128xi32>
    %55 = arith.subi %54, %31 : vector<16x128xi32>
    %56 = arith.ori %53, %55 : vector<16x128xi32>
    %cst_30 = arith.constant dense<-2147483648> : vector<16xi32>
    %57 = vector.multi_reduction <maxsi>, %56, %cst_30 [1] : vector<16x128xi32> to vector<16xi32>
    %58 = vector.shape_cast %57 : vector<16xi32> to vector<16x1xi32>
    %c127_i32_31 = arith.constant 127 : i32
    %59 = vector.broadcast %c127_i32_31 : i32 to vector<16x1xi32>
    %60 = arith.andi %58, %59 : vector<16x1xi32>
    %c127_i32_32 = arith.constant 127 : i32
    %61 = vector.broadcast %c127_i32_32 : i32 to vector<16x1xi32>
    %62 = arith.subi %61, %60 : vector<16x1xi32>
    %63 = vector.broadcast %62 : vector<16x1xi32> to vector<16x128xi32>
    %64 = arith.cmpi eq, %31, %63 : vector<16x128xi32>
    %65 = arith.extui %64 : vector<16x128xi1> to vector<16x128xi32>
    %66 = arith.sitofp %65 : vector<16x128xi32> to vector<16x128xf32>
    %c0_33 = arith.constant 0 : index
    %c0_34 = arith.constant 0 : index
    %67 = vector.load %arg11[%c0_33, %c0_34] : memref<16x128xf32, #tpu.memory_space<vmem>>, vector<16x128xf32>
    tpu.vector_store %arg11[%c0_33, %c0_34], %66 {strides = array<i32>} : memref<16x128xf32, #tpu.memory_space<vmem>>, vector<16x128xf32>,
    return
  }
  func.func @transform_0(%arg0: i32) -> (i32, i32) {
    %c0_i32 = arith.constant 0 : i32
    %c0_i32_0 = arith.constant 0 : i32
    return %arg0, %c0_i32 : i32, i32
  }
  func.func @transform_1(%arg0: i32) -> (i32, i32) {
    %c0_i32 = arith.constant 0 : i32
    %c0_i32_0 = arith.constant 0 : i32
    %c0_i32_1 = arith.constant 0 : i32
    return %c0_i32, %c0_i32_0 : i32, i32
  }
  func.func @transform_2(%arg0: i32) -> (i32, i32) {
    %c0_i32 = arith.constant 0 : i32
    %c0_i32_0 = arith.constant 0 : i32
    %c0_i32_1 = arith.constant 0 : i32
    return %c0_i32, %c0_i32_0 : i32, i32
  }
  func.func @transform_3(%arg0: i32) -> (i32, i32) {
    %c0_i32 = arith.constant 0 : i32
    %c0_i32_0 = arith.constant 0 : i32
    %c0_i32_1 = arith.constant 0 : i32
    return %c0_i32, %c0_i32_0 : i32, i32
  }
  func.func @transform_4(%arg0: i32) -> (i32, i32) {
    %c0_i32 = arith.constant 0 : i32
    %c0_i32_0 = arith.constant 0 : i32
    %c0_i32_1 = arith.constant 0 : i32
    return %c0_i32, %c0_i32_0 : i32, i32
  }
  func.func @transform_5(%arg0: i32) -> (i32, i32) {
    %c0_i32 = arith.constant 0 : i32
    %c0_i32_0 = arith.constant 0 : i32
    %c0_i32_1 = arith.constant 0 : i32
    return %c0_i32, %c0_i32_0 : i32, i32
  }
  func.func @transform_6(%arg0: i32) -> (i32, i32) {
    %c0_i32 = arith.constant 0 : i32
    %c0_i32_0 = arith.constant 0 : i32
    %c0_i32_1 = arith.constant 0 : i32
    return %c0_i32, %c0_i32_0 : i32, i32
  }
  func.func @transform_7(%arg0: i32) -> (i32, i32) {
    %c0_i32 = arith.constant 0 : i32
    %c0_i32_0 = arith.constant 0 : i32
    %c0_i32_1 = arith.constant 0 : i32
    return %c0_i32, %c0_i32_0 : i32, i32
  }
  func.func @transform_8(%arg0: i32) -> (i32, i32) {
    %c0_i32 = arith.constant 0 : i32
    %c0_i32_0 = arith.constant 0 : i32
    return %arg0, %c0_i32 : i32, i32
  }
  func.func @transform_9(%arg0: i32) -> (i32, i32) {
    %c0_i32 = arith.constant 0 : i32
    %c0_i32_0 = arith.constant 0 : i32
    return %arg0, %c0_i32 : i32, i32
  }
  func.func @transform_10(%arg0: i32) -> (i32, i32) {
    %c0_i32 = arith.constant 0 : i32
    %c0_i32_0 = arith.constant 0 : i32
    return %arg0, %c0_i32 : i32, i32
  }
}

</mosaic_0001>

<bundles_post_ra>
// kernel: tpu_custom_call.1
= control target key start
LH: loop header
LB: loop body
LE: loop exit
PB: predicated region body
PF: predicated region fallthrough
CT: control target
= control target key end

     0   :  { %16 = vsyncpa [#allocation3], 0  ;;  %s4035_s0 = inlined_call_operand.hbm [shape: bf16[16,128], index: 0, kind: input, shape index: {}]   ;;  %s4036_s1 = inlined_call_operand.hbm [shape: bf16[128,512], index: 1, kind: input, shape index: {}]   ;;  %s4037_s2 = inlined_call_operand.hbm [shape: bf16[512,512], index: 2, kind: input, shape index: {}]   ;;  %s4038_s3 = inlined_call_operand.vmem [shape: f32[1,512], index: 3, kind: input, shape index: {}]   ;;  %s4039_s4 = inlined_call_operand.hbm [shape: bf16[512,512], index: 4, kind: input, shape index: {}]   ;;  %s4040_s5 = inlined_call_operand.vmem [shape: f32[1,512], index: 5, kind: input, shape index: {}]   ;;  %s4041_s6 = inlined_call_operand.hbm [shape: bf16[512,128], index: 6, kind: input, shape index: {}]   ;;  %s4042_s7 = inlined_call_operand.vmem [shape: f32[1,128], index: 7, kind: input, shape index: {}]   ;;  %s4043_s8 = inlined_call_operand.hbm [shape: f32[16,128], index: 8, kind: input, shape index: {}]   ;;  %s4044_s9 = inlined_call_operand.hbm [shape: f32[16,128], index: 9, kind: output, shape index: {0}]   ;;  %s4045_s10 = inlined_call_operand.hbm [shape: f32[16,128], index: 10, kind: output, shape index: {1}]  }
   0x1   :  { %17 = vsyncpa [#allocation6], 0 }
   0x2   :  { %18 = vsyncpa [#allocation9], 0 }
   0x3   :  { %19 = vsyncpa [#allocation12], 0 }
   0x4   :  { %20 = vsyncpa [#allocation4], 0 }
   0x5   :  { %21 = vsyncpa [#allocation15], 0  ;;  %s3845_s13 = smov [#allocation5]  }
   0x6   :  { %s39_s14 = sshll.u32 %s3845_s13, 4  ;;  %s40_s14 = int_to_ptr.vmem [resolvable:$true] %s39_s14 }
   0x7   :  { %s3681_s15 = scalar_lea.vmem %s40_s14, 4096  ;;  %p3686_p1 = scmp.lt.s32.totalorder %s40_s14, %s40_s14 }
   0x8   :  { %p3682_p0 = scmp.ne.s32.totalorder %s40_s14, %s3681_s15  ;;  %p3687_p2 = scmp.lt.s32.totalorder %s3681_s15, %s3681_s15 }
   0xa   :  { %p3688_p3 = por %p3687_p2, %p3686_p1 }
   0xc   :  { %p3689_p4 = pnand %p3688_p3, %p3682_p0 }
   0xe   :  { %3692 = shalt.err (!%p3689_p4)
}
   0xf   :  { %s3846_s16 = smov 256   ;;  %s3847_s17 = smov 16  }
  0x10   :  { %45 = dma.hbm_to_vmem [thread:$0]  %s4036_s1, 4096, %s40_s14, [#allocation6], %s3846_s16, %s3846_s16, %s3847_s17  }
  0x11   :  { %s3848_s20 = smov [#allocation8]   ;;  %s3849_s22 = smov [#allocation2]  }
  0x12   :  { %s65_s21 = sshll.u32 %s3848_s20, 4  ;;  %s27_s23 = sshll.u32 %s3849_s22, 4  ;;  %s66_s21 = int_to_ptr.vmem [resolvable:$true] %s65_s21  ;;  %s28_s23 = int_to_ptr.vmem [resolvable:$true] %s27_s23 }
  0x13   :  { %s3701_s24 = scalar_lea.vmem %s66_s21, 16384  ;;  %p3706_p6 = scmp.lt.s32.totalorder %s66_s21, %s66_s21 }
  0x14   :  { %p3702_p5 = scmp.ne.s32.totalorder %s66_s21, %s3701_s24  ;;  %p3707_p7 = scmp.lt.s32.totalorder %s3701_s24, %s3701_s24 }
  0x16   :  { %p3708_p8 = por %p3707_p7, %p3706_p6 }
  0x18   :  { %p3709_p9 = pnand %p3708_p8, %p3702_p5 }
  0x1a   :  { %3712 = shalt.err (!%p3709_p9)
}
  0x1b   :  { %71 = dma.hbm_to_vmem [thread:$0]  %s4039_s4, 16384, %s66_s21, [#allocation9], %s3846_s16, %s3846_s16, %s3847_s17  }
  0x1c   :  { %s3721_s1 = scalar_lea.vmem %s28_s23, 128  ;;  %p3726_p11 = scmp.lt.s32.totalorder %s28_s23, %s28_s23 }
  0x1d   :  { %p3722_p10 = scmp.ne.s32.totalorder %s28_s23, %s3721_s1  ;;  %p3727_p12 = scmp.lt.s32.totalorder %s3721_s1, %s3721_s1 }
  0x1f   :  { %p3728_p13 = por %p3727_p12, %p3726_p11 }
  0x21   :  { %p3729_p0 = pnand %p3728_p13, %p3722_p10 }
  0x23   :  { %3732 = shalt.err (!%p3729_p0)
}
  0x24   :  { %s3850_s27 = smov 64   ;;  %s3851_s28 = smov 4  }
  0x25   :  { %33 = dma.hbm_to_vmem [thread:$0]  %s4035_s0, 128, %s28_s23, [#allocation3], %s3850_s27, %s3850_s27, %s3851_s28  }
  0x26   :  { %s3852_s11 = smov [#allocation7]   ;;  %s3853_s13 = smov [#allocation10]  }
  0x27   :  { %s51_s12 = sshll.u32 %s3852_s11, 4  ;;  %s79_s14 = sshll.u32 %s3853_s13, 4  ;;  %s52_s12 = int_to_ptr.vmem [resolvable:$true] %s51_s12  ;;  %s80_s14 = int_to_ptr.vmem [resolvable:$true] %s79_s14 }
  0x28   :  { %s3741_s4 = scalar_lea.vmem %s52_s12, 16384  ;;  %p3746_p2 = scmp.lt.s32.totalorder %s52_s12, %s52_s12 }
  0x29   :  { %p3742_p1 = scmp.ne.s32.totalorder %s52_s12, %s3741_s4  ;;  %p3747_p3 = scmp.lt.s32.totalorder %s3741_s4, %s3741_s4 }
  0x2b   :  { %p3748_p4 = por %p3747_p3, %p3746_p2 }
  0x2d   :  { %p3749_p5 = pnand %p3748_p4, %p3742_p1 }
  0x2f   :  { %3752 = shalt.err (!%p3749_p5)
}
  0x30   :  { %57 = dma.hbm_to_vmem [thread:$0]  %s4037_s2, 16384, %s52_s12, [#allocation6], %s3846_s16, %s3846_s16, %s3847_s17  }
  0x31   :  { %s3761_s0 = scalar_lea.vmem %s80_s14, 4096  ;;  %p3766_p7 = scmp.lt.s32.totalorder %s80_s14, %s80_s14 }
  0x32   :  { %p3762_p6 = scmp.ne.s32.totalorder %s80_s14, %s3761_s0  ;;  %p3767_p8 = scmp.lt.s32.totalorder %s3761_s0, %s3761_s0 }
  0x34   :  { %p3768_p9 = por %p3767_p8, %p3766_p7 }
  0x36   :  { %p3769_p10 = pnand %p3768_p9, %p3762_p6 }
  0x38   :  { %3772 = shalt.err (!%p3769_p10)
}
  0x39   :  { %85 = dma.hbm_to_vmem [thread:$0]  %s4041_s6, 4096, %s80_s14, [#allocation9], %s3850_s27, %s3850_s27, %s3851_s28  }
  0x3a   :  { %s3854_s21 = smov [#allocation11]  }
  0x3b   :  { %s93_s22 = sshll.u32 %s3854_s21, 4  ;;  %s94_s22 = int_to_ptr.vmem [resolvable:$true] %s93_s22 }
  0x3c   :  { %s3781_s23 = scalar_lea.vmem %s94_s22, 256  ;;  %p3786_p12 = scmp.lt.s32.totalorder %s94_s22, %s94_s22 }
  0x3d   :  { %p3782_p11 = scmp.ne.s32.totalorder %s94_s22, %s3781_s23  ;;  %p3787_p13 = scmp.lt.s32.totalorder %s3781_s23, %s3781_s23 }
  0x3f   :  { %p3788_p0 = por %p3787_p13, %p3786_p12 }
  0x41   :  { %p3789_p1 = pnand %p3788_p0, %p3782_p11 }
  0x43   :  { %3792 = shalt.err (!%p3789_p1)
}
  0x44   :  { %s3855_s2 = smov 128   ;;  %s3856_s16 = smov 8  }
  0x45   :  { %99 = dma.hbm_to_vmem [thread:$0]  %s4043_s8, 256, %s94_s22, [#allocation12], %s3855_s2, %s3855_s2, %s3856_s16  }
  0x46   :  { %3833 = dma.done.wait [#allocation3], 128  }
  0x47   :  { %3834 = vsyncadd [#allocation3], 4294967168 }
  0x48   :  { %3835 = dma.done.wait [#allocation6], 20480  }
  0x49   :  { %3836 = vsyncadd [#allocation6], 4294946816 }
  0x4a   :  { %3837 = dma.done.wait [#allocation9], 20480  }
  0x4b   :  { %3838 = vsyncadd [#allocation9], 4294946816 }
  0x4c   :  { %3839 = dma.done.wait [#allocation12], 256  }
  0x4d   :  { %3840 = vsyncadd [#allocation12], 4294967040  ;;  %v3857_v0 = vmov 0   ;;  %v3200_v1 = vld [vmem:[#allocation5 + $0xe4] ss:$16 sps:$4 sm:$0xff]   ;;  %v3248_v35 = vld [vmem:[#allocation2] sm:$0xff]  }
  0x4e   :  { %351 = vmatprep.mubr.bf16.mxu0 %v3857_v0  ;;  %394 = vmatprep.mubr.bf16.mxu1 %v3857_v0  ;;  %v3202_v2 = vld [vmem:[#allocation5 + $0xec] ss:$16 sps:$4 sm:$0xff]   ;;  %v3204_v3 = vld [vmem:[#allocation5 + $0xe0] ss:$16 sps:$4 sm:$0xff]   ;;  %v3205_v4 = vld [vmem:[#allocation5 + $0xe8] ss:$16 sps:$4 sm:$0xff]  }
  0x4f   :  { %319 = vmatprep.subr.bf16.mxu0 %v3200_v1  ;;  %362 = vmatprep.subr.bf16.mxu1 %v3202_v2  ;;  %v3206_v5 = vld [vmem:[#allocation5 + $0xc4] ss:$16 sps:$4 sm:$0xff]   ;;  %v3208_v6 = vld [vmem:[#allocation5 + $0xcc] ss:$16 sps:$4 sm:$0xff]   ;;  %v3210_v7 = vld [vmem:[#allocation5 + $0xc0] ss:$16 sps:$4 sm:$0xff]  }
  0x50   :  { %320 = vmatpush1.bf16.msra.mxu0 %v3204_v3  ;;  %363 = vmatpush1.bf16.msra.mxu1 %v3205_v4  ;;  %v3211_v8 = vld [vmem:[#allocation5 + $0xc8] ss:$16 sps:$4 sm:$0xff]   ;;  %v3212_v9 = vld [vmem:[#allocation5 + $0xa4] ss:$16 sps:$4 sm:$0xff]   ;;  %v3214_v10 = vld [vmem:[#allocation5 + $0xac] ss:$16 sps:$4 sm:$0xff]  }
  0x51   :  { %321 = vmatprep.subr.bf16.mxu0 %v3206_v5  ;;  %364 = vmatprep.subr.bf16.mxu1 %v3208_v6  ;;  %v3216_v11 = vld [vmem:[#allocation5 + $0xa0] ss:$16 sps:$4 sm:$0xff]   ;;  %v3217_v12 = vld [vmem:[#allocation5 + $0xa8] ss:$16 sps:$4 sm:$0xff]   ;;  %v3218_v13 = vld [vmem:[#allocation5 + $0x84] ss:$16 sps:$4 sm:$0xff]  }
  0x52   :  { %v3220_v14 = vld [vmem:[#allocation5 + $0x8c] ss:$16 sps:$4 sm:$0xff]   ;;  %v3222_v15 = vld [vmem:[#allocation5 + $0x80] ss:$16 sps:$4 sm:$0xff]   ;;  %v3223_v16 = vld [vmem:[#allocation5 + $0x88] ss:$16 sps:$4 sm:$0xff]  }
  0x53   :  { %v3224_v17 = vld [vmem:[#allocation5 + $0x64] ss:$16 sps:$4 sm:$0xff]   ;;  %v3226_v18 = vld [vmem:[#allocation5 + $0x6c] ss:$16 sps:$4 sm:$0xff]   ;;  %v3228_v19 = vld [vmem:[#allocation5 + $0x60] ss:$16 sps:$4 sm:$0xff]  }
  0x54   :  { %322 = vmatpush1.bf16.msra.mxu0 %v3210_v7  ;;  %365 = vmatpush1.bf16.msra.mxu1 %v3211_v8  ;;  %v3229_v20 = vld [vmem:[#allocation5 + $0x68] ss:$16 sps:$4 sm:$0xff]   ;;  %v3230_v21 = vld [vmem:[#allocation5 + $0x44] ss:$16 sps:$4 sm:$0xff]   ;;  %v3232_v22 = vld [vmem:[#allocation5 + $0x4c] ss:$16 sps:$4 sm:$0xff]  }
  0x55   :  { %323 = vmatprep.subr.bf16.mxu0 %v3212_v9  ;;  %366 = vmatprep.subr.bf16.mxu1 %v3214_v10  ;;  %v3234_v23 = vld [vmem:[#allocation5 + $0x40] ss:$16 sps:$4 sm:$0xff]   ;;  %v3235_v24 = vld [vmem:[#allocation5 + $0x48] ss:$16 sps:$4 sm:$0xff]   ;;  %v3236_v25 = vld [vmem:[#allocation5 + $0x24] ss:$16 sps:$4 sm:$0xff]  }
  0x56   :  { %v3238_v26 = vld [vmem:[#allocation5 + $0x2c] ss:$16 sps:$4 sm:$0xff]   ;;  %v3240_v27 = vld [vmem:[#allocation5 + $0x20] ss:$16 sps:$4 sm:$0xff]   ;;  %v3241_v28 = vld [vmem:[#allocation5 + $0x28] ss:$16 sps:$4 sm:$0xff]  }
  0x57   :  { %v3242_v29 = vld [vmem:[#allocation5 + $0x4] ss:$16 sps:$4 sm:$0xff]   ;;  %v3244_v30 = vld [vmem:[#allocation5 + $0xc] ss:$16 sps:$4 sm:$0xff]   ;;  %v3246_v31 = vld [vmem:[#allocation5] ss:$16 sps:$4 sm:$0xff]  }
  0x58   :  { %324 = vmatpush1.bf16.msra.mxu0 %v3216_v11  ;;  %367 = vmatpush1.bf16.msra.mxu1 %v3217_v12  ;;  %v3247_v32 = vld [vmem:[#allocation5 + $0x8] ss:$16 sps:$4 sm:$0xff]   ;;  %v3251_v33 = vld [vmem:[#allocation7 + $0xe4] ss:$16 sps:$4 sm:$0xff]   ;;  %v3249_v36 = vld [vmem:[#allocation7 + $0xe0] ss:$16 sps:$4 sm:$0xff]  }
  0x59   :  { %325 = vmatprep.subr.bf16.mxu0 %v3218_v13  ;;  %368 = vmatprep.subr.bf16.mxu1 %v3220_v14  ;;  %v3254_v34 = vld [vmem:[#allocation7 + $0x2e4] ss:$16 sps:$4 sm:$0xff]   ;;  %v3252_v37 = vld [vmem:[#allocation7 + $0x2e0] ss:$16 sps:$4 sm:$0xff]  }
  0x5a   :  { %v3257_v38 = vld [vmem:[#allocation7 + $0xc4] ss:$16 sps:$4 sm:$0xff]   ;;  %v3255_v40 = vld [vmem:[#allocation7 + $0xc0] ss:$16 sps:$4 sm:$0xff]  }
  0x5b   :  { %v3260_v39 = vld [vmem:[#allocation7 + $0x2c4] ss:$16 sps:$4 sm:$0xff]   ;;  %v3258_v41 = vld [vmem:[#allocation7 + $0x2c0] ss:$16 sps:$4 sm:$0xff]  }
  0x5c   :  { %326 = vmatpush1.bf16.msra.mxu0 %v3222_v15  ;;  %369 = vmatpush1.bf16.msra.mxu1 %v3223_v16  ;;  %v3263_v42 = vld [vmem:[#allocation7 + $0xa4] ss:$16 sps:$4 sm:$0xff]   ;;  %v3261_v44 = vld [vmem:[#allocation7 + $0xa0] ss:$16 sps:$4 sm:$0xff]  }
  0x5d   :  { %327 = vmatprep.subr.bf16.mxu0 %v3224_v17  ;;  %370 = vmatprep.subr.bf16.mxu1 %v3226_v18  ;;  %v3266_v43 = vld [vmem:[#allocation7 + $0x2a4] ss:$16 sps:$4 sm:$0xff]   ;;  %v3264_v45 = vld [vmem:[#allocation7 + $0x2a0] ss:$16 sps:$4 sm:$0xff]  }
  0x5e   :  { %v3269_v46 = vld [vmem:[#allocation7 + $0x84] ss:$16 sps:$4 sm:$0xff]   ;;  %v3267_v48 = vld [vmem:[#allocation7 + $0x80] ss:$16 sps:$4 sm:$0xff]  }
  0x5f   :  { %v3272_v47 = vld [vmem:[#allocation7 + $0x284] ss:$16 sps:$4 sm:$0xff]   ;;  %v3270_v49 = vld [vmem:[#allocation7 + $0x280] ss:$16 sps:$4 sm:$0xff]  }
  0x60   :  { %328 = vmatpush1.bf16.msra.mxu0 %v3228_v19  ;;  %371 = vmatpush1.bf16.msra.mxu1 %v3229_v20  ;;  %v3275_v50 = vld [vmem:[#allocation7 + $0x64] ss:$16 sps:$4 sm:$0xff]   ;;  %v3273_v52 = vld [vmem:[#allocation7 + $0x60] ss:$16 sps:$4 sm:$0xff]  }
  0x61   :  { %329 = vmatprep.subr.bf16.mxu0 %v3230_v21  ;;  %372 = vmatprep.subr.bf16.mxu1 %v3232_v22  ;;  %v3278_v51 = vld [vmem:[#allocation7 + $0x264] ss:$16 sps:$4 sm:$0xff]   ;;  %v3276_v53 = vld [vmem:[#allocation7 + $0x260] ss:$16 sps:$4 sm:$0xff]  }
  0x62   :  { %v3281_v54 = vld [vmem:[#allocation7 + $0x44] ss:$16 sps:$4 sm:$0xff]   ;;  %v3279_v56 = vld [vmem:[#allocation7 + $0x40] ss:$16 sps:$4 sm:$0xff]  }
  0x63   :  { %v3284_v55 = vld [vmem:[#allocation7 + $0x244] ss:$16 sps:$4 sm:$0xff]   ;;  %v3282_v57 = vld [vmem:[#allocation7 + $0x240] ss:$16 sps:$4 sm:$0xff]  }
  0x64   :  { %330 = vmatpush1.bf16.msra.mxu0 %v3234_v23  ;;  %373 = vmatpush1.bf16.msra.mxu1 %v3235_v24  ;;  %v3287_v58 = vld [vmem:[#allocation7 + $0x24] ss:$16 sps:$4 sm:$0xff]   ;;  %v3285_v60 = vld [vmem:[#allocation7 + $0x20] ss:$16 sps:$4 sm:$0xff]  }
  0x65   :  { %331 = vmatprep.subr.bf16.mxu0 %v3236_v25  ;;  %374 = vmatprep.subr.bf16.mxu1 %v3238_v26  ;;  %v3290_v59 = vld [vmem:[#allocation7 + $0x224] ss:$16 sps:$4 sm:$0xff]   ;;  %v3288_v61 = vld [vmem:[#allocation7 + $0x220] ss:$16 sps:$4 sm:$0xff]  }
  0x66   :  { %v3293_v62 = vld [vmem:[#allocation7 + $0x4] ss:$16 sps:$4 sm:$0xff]   ;;  %v3291_v1 = vld [vmem:[#allocation7] ss:$16 sps:$4 sm:$0xff]  }
  0x67   :  { %v3296_v63 = vld [vmem:[#allocation7 + $0x204] ss:$16 sps:$4 sm:$0xff]   ;;  %v3294_v2 = vld [vmem:[#allocation7 + $0x200] ss:$16 sps:$4 sm:$0xff]  }
  0x68   :  { %332 = vmatpush1.bf16.msra.mxu0 %v3240_v27  ;;  %375 = vmatpush1.bf16.msra.mxu1 %v3241_v28  ;;  %v3299_v3 = vld [vmem:[#allocation7 + $0x1e4] ss:$16 sps:$4 sm:$0xff]   ;;  %v3297_v5 = vld [vmem:[#allocation7 + $0x1e0] ss:$16 sps:$4 sm:$0xff]  }
  0x69   :  { %333 = vmatprep.subr.bf16.mxu0 %v3242_v29  ;;  %376 = vmatprep.subr.bf16.mxu1 %v3244_v30  ;;  %v3302_v4 = vld [vmem:[#allocation7 + $0x3e4] ss:$16 sps:$4 sm:$0xff]   ;;  %v3300_v6 = vld [vmem:[#allocation7 + $0x3e0] ss:$16 sps:$4 sm:$0xff]  }
  0x6a   :  { %v3305_v7 = vld [vmem:[#allocation7 + $0x1c4] ss:$16 sps:$4 sm:$0xff]   ;;  %v3303_v9 = vld [vmem:[#allocation7 + $0x1c0] ss:$16 sps:$4 sm:$0xff]  }
  0x6b   :  { %v3308_v8 = vld [vmem:[#allocation7 + $0x3c4] ss:$16 sps:$4 sm:$0xff]   ;;  %v3306_v10 = vld [vmem:[#allocation7 + $0x3c0] ss:$16 sps:$4 sm:$0xff]  }
  0x6c   :  { %334 = vmatpush1.bf16.msra.mxu0 %v3246_v31  ;;  %377 = vmatpush1.bf16.msra.mxu1 %v3247_v32  ;;  %v3311_v11 = vld [vmem:[#allocation7 + $0x1a4] ss:$16 sps:$4 sm:$0xff]   ;;  %v3309_v13 = vld [vmem:[#allocation7 + $0x1a0] ss:$16 sps:$4 sm:$0xff]  }
  0x6d   :  { %1203 = vmatprep.subr.bf16.mxu0 %v3251_v33  ;;  %1246 = vmatprep.subr.bf16.mxu1 %v3254_v34  ;;  %v3314_v12 = vld [vmem:[#allocation7 + $0x3a4] ss:$16 sps:$4 sm:$0xff]   ;;  %v3312_v14 = vld [vmem:[#allocation7 + $0x3a0] ss:$16 sps:$4 sm:$0xff]  }
  0x6e   :  { %v3317_v15 = vld [vmem:[#allocation7 + $0x184] ss:$16 sps:$4 sm:$0xff]   ;;  %v3315_v17 = vld [vmem:[#allocation7 + $0x180] ss:$16 sps:$4 sm:$0xff]  }
  0x6f   :  { %352 = vmatmul.mubr.bf16.vlgmr.msra.gmra.mxu0 %v3248_v35  ;;  %395 = vmatmul.mubr.bf16.vlgmr.msra.gmra.mxu1 %v3248_v35  ;;  %v3320_v16 = vld [vmem:[#allocation7 + $0x384] ss:$16 sps:$4 sm:$0xff]   ;;  %v3318_v18 = vld [vmem:[#allocation7 + $0x380] ss:$16 sps:$4 sm:$0xff]   ;;  %v3347_v35 = vld [vmem:[#allocation7 + $0xec] ss:$16 sps:$4 sm:$0xff]  }
  0x70   :  { %1204 = vmatpush1.bf16.msra.mxu0 %v3249_v36  ;;  %1247 = vmatpush1.bf16.msra.mxu1 %v3252_v37  ;;  %v3323_v19 = vld [vmem:[#allocation7 + $0x164] ss:$16 sps:$4 sm:$0xff]   ;;  %v3321_v21 = vld [vmem:[#allocation7 + $0x160] ss:$16 sps:$4 sm:$0xff]   ;;  %v3350_v36 = vld [vmem:[#allocation7 + $0x2ec] ss:$16 sps:$4 sm:$0xff]  }
  0x71   :  { %1205 = vmatprep.subr.bf16.mxu0 %v3257_v38  ;;  %1248 = vmatprep.subr.bf16.mxu1 %v3260_v39  ;;  %v3326_v20 = vld [vmem:[#allocation7 + $0x364] ss:$16 sps:$4 sm:$0xff]   ;;  %v3324_v22 = vld [vmem:[#allocation7 + $0x360] ss:$16 sps:$4 sm:$0xff]  }
  0x72   :  { %v3329_v23 = vld [vmem:[#allocation7 + $0x144] ss:$16 sps:$4 sm:$0xff]   ;;  %v3327_v25 = vld [vmem:[#allocation7 + $0x140] ss:$16 sps:$4 sm:$0xff]  }
  0x73   :  { %v3332_v24 = vld [vmem:[#allocation7 + $0x344] ss:$16 sps:$4 sm:$0xff]   ;;  %v3330_v26 = vld [vmem:[#allocation7 + $0x340] ss:$16 sps:$4 sm:$0xff]  }
  0x74   :  { %1206 = vmatpush1.bf16.msra.mxu0 %v3255_v40  ;;  %1249 = vmatpush1.bf16.msra.mxu1 %v3258_v41  ;;  %v3335_v27 = vld [vmem:[#allocation7 + $0x124] ss:$16 sps:$4 sm:$0xff]   ;;  %v3333_v29 = vld [vmem:[#allocation7 + $0x120] ss:$16 sps:$4 sm:$0xff]  }
  0x75   :  { %1207 = vmatprep.subr.bf16.mxu0 %v3263_v42  ;;  %1250 = vmatprep.subr.bf16.mxu1 %v3266_v43  ;;  %v3338_v28 = vld [vmem:[#allocation7 + $0x324] ss:$16 sps:$4 sm:$0xff]   ;;  %v3336_v30 = vld [vmem:[#allocation7 + $0x320] ss:$16 sps:$4 sm:$0xff]  }
  0x76   :  { %v3341_v31 = vld [vmem:[#allocation7 + $0x104] ss:$16 sps:$4 sm:$0xff]   ;;  %v3339_v33 = vld [vmem:[#allocation7 + $0x100] ss:$16 sps:$4 sm:$0xff]  }
  0x77   :  { %v3344_v32 = vld [vmem:[#allocation7 + $0x304] ss:$16 sps:$4 sm:$0xff]   ;;  %v3342_v34 = vld [vmem:[#allocation7 + $0x300] ss:$16 sps:$4 sm:$0xff]  }
  0x78   :  { %1208 = vmatpush1.bf16.msra.mxu0 %v3261_v44  ;;  %1251 = vmatpush1.bf16.msra.mxu1 %v3264_v45 }
  0x79   :  { %1209 = vmatprep.subr.bf16.mxu0 %v3269_v46  ;;  %1252 = vmatprep.subr.bf16.mxu1 %v3272_v47 }
  0x7c   :  { %1210 = vmatpush1.bf16.msra.mxu0 %v3267_v48  ;;  %1253 = vmatpush1.bf16.msra.mxu1 %v3270_v49 }
  0x7d   :  { %1211 = vmatprep.subr.bf16.mxu0 %v3275_v50  ;;  %1254 = vmatprep.subr.bf16.mxu1 %v3278_v51  ;;  %v3345_v51 = vld [vmem:[#allocation7 + $0xe8] ss:$16 sps:$4 sm:$0xff]  }
  0x80   :  { %1212 = vmatpush1.bf16.msra.mxu0 %v3273_v52  ;;  %1255 = vmatpush1.bf16.msra.mxu1 %v3276_v53  ;;  %v3348_v52 = vld [vmem:[#allocation7 + $0x2e8] ss:$16 sps:$4 sm:$0xff]  }
  0x81   :  { %1213 = vmatprep.subr.bf16.mxu0 %v3281_v54  ;;  %1256 = vmatprep.subr.bf16.mxu1 %v3284_v55  ;;  %v3353_v55 = vld [vmem:[#allocation7 + $0xcc] ss:$16 sps:$4 sm:$0xff]  }
  0x84   :  { %1214 = vmatpush1.bf16.msra.mxu0 %v3279_v56  ;;  %1257 = vmatpush1.bf16.msra.mxu1 %v3282_v57  ;;  %v3356_v56 = vld [vmem:[#allocation7 + $0x2cc] ss:$16 sps:$4 sm:$0xff]   ;;  %v3351_v57 = vld [vmem:[#allocation7 + $0xc8] ss:$16 sps:$4 sm:$0xff]  }
  0x85   :  { %1215 = vmatprep.subr.bf16.mxu0 %v3287_v58  ;;  %1258 = vmatprep.subr.bf16.mxu1 %v3290_v59  ;;  %v3354_v58 = vld [vmem:[#allocation7 + $0x2c8] ss:$16 sps:$4 sm:$0xff]   ;;  %v3359_v59 = vld [vmem:[#allocation7 + $0xac] ss:$16 sps:$4 sm:$0xff]  }
  0x88   :  { %1216 = vmatpush1.bf16.msra.mxu0 %v3285_v60  ;;  %1259 = vmatpush1.bf16.msra.mxu1 %v3288_v61  ;;  %v3362_v60 = vld [vmem:[#allocation7 + $0x2ac] ss:$16 sps:$4 sm:$0xff]   ;;  %v3357_v61 = vld [vmem:[#allocation7 + $0xa8] ss:$16 sps:$4 sm:$0xff]  }
  0x89   :  { %1217 = vmatprep.subr.bf16.mxu0 %v3293_v62  ;;  %1260 = vmatprep.subr.bf16.mxu1 %v3296_v63  ;;  %v3360_v62 = vld [vmem:[#allocation7 + $0x2a8] ss:$16 sps:$4 sm:$0xff]   ;;  %v3365_v63 = vld [vmem:[#allocation7 + $0x8c] ss:$16 sps:$4 sm:$0xff]  }
  0x8c   :  { %1218 = vmatpush1.bf16.msra.mxu0 %v3291_v1  ;;  %1261 = vmatpush1.bf16.msra.mxu1 %v3294_v2  ;;  %v3368_v1 = vld [vmem:[#allocation7 + $0x28c] ss:$16 sps:$4 sm:$0xff]   ;;  %v3363_v2 = vld [vmem:[#allocation7 + $0x88] ss:$16 sps:$4 sm:$0xff]  }
  0x8d   :  { %1219 = vmatprep.subr.bf16.mxu0 %v3299_v3  ;;  %1262 = vmatprep.subr.bf16.mxu1 %v3302_v4  ;;  %v3366_v3 = vld [vmem:[#allocation7 + $0x288] ss:$16 sps:$4 sm:$0xff]   ;;  %v3371_v4 = vld [vmem:[#allocation7 + $0x6c] ss:$16 sps:$4 sm:$0xff]  }
  0x90   :  { %1220 = vmatpush2.bf16.msra.mxu0 %v3297_v5  ;;  %1263 = vmatpush2.bf16.msra.mxu1 %v3300_v6  ;;  %v3374_v5 = vld [vmem:[#allocation7 + $0x26c] ss:$16 sps:$4 sm:$0xff]   ;;  %v3369_v6 = vld [vmem:[#allocation7 + $0x68] ss:$16 sps:$4 sm:$0xff]  }
  0x91   :  { %1221 = vmatprep.subr.bf16.mxu0 %v3305_v7  ;;  %1264 = vmatprep.subr.bf16.mxu1 %v3308_v8  ;;  %v3372_v7 = vld [vmem:[#allocation7 + $0x268] ss:$16 sps:$4 sm:$0xff]   ;;  %v3377_v8 = vld [vmem:[#allocation7 + $0x4c] ss:$16 sps:$4 sm:$0xff]  }
  0x94   :  { %1222 = vmatpush2.bf16.msra.mxu0 %v3303_v9  ;;  %1265 = vmatpush2.bf16.msra.mxu1 %v3306_v10  ;;  %v3380_v9 = vld [vmem:[#allocation7 + $0x24c] ss:$16 sps:$4 sm:$0xff]   ;;  %v3375_v10 = vld [vmem:[#allocation7 + $0x48] ss:$16 sps:$4 sm:$0xff]  }
  0x95   :  { %1223 = vmatprep.subr.bf16.mxu0 %v3311_v11  ;;  %1266 = vmatprep.subr.bf16.mxu1 %v3314_v12  ;;  %v3378_v11 = vld [vmem:[#allocation7 + $0x248] ss:$16 sps:$4 sm:$0xff]   ;;  %v3383_v12 = vld [vmem:[#allocation7 + $0x2c] ss:$16 sps:$4 sm:$0xff]  }
  0x98   :  { %1224 = vmatpush2.bf16.msra.mxu0 %v3309_v13  ;;  %1267 = vmatpush2.bf16.msra.mxu1 %v3312_v14  ;;  %v3386_v13 = vld [vmem:[#allocation7 + $0x22c] ss:$16 sps:$4 sm:$0xff]   ;;  %v3381_v14 = vld [vmem:[#allocation7 + $0x28] ss:$16 sps:$4 sm:$0xff]  }
  0x99   :  { %1225 = vmatprep.subr.bf16.mxu0 %v3317_v15  ;;  %1268 = vmatprep.subr.bf16.mxu1 %v3320_v16  ;;  %v3384_v15 = vld [vmem:[#allocation7 + $0x228] ss:$16 sps:$4 sm:$0xff]   ;;  %v3389_v16 = vld [vmem:[#allocation7 + $0xc] ss:$16 sps:$4 sm:$0xff]  }
  0x9c   :  { %1226 = vmatpush2.bf16.msra.mxu0 %v3315_v17  ;;  %1269 = vmatpush2.bf16.msra.mxu1 %v3318_v18  ;;  %v3392_v17 = vld [vmem:[#allocation7 + $0x20c] ss:$16 sps:$4 sm:$0xff]   ;;  %v3387_v18 = vld [vmem:[#allocation7 + $0x8] ss:$16 sps:$4 sm:$0xff]  }
  0x9d   :  { %1227 = vmatprep.subr.bf16.mxu0 %v3323_v19  ;;  %1270 = vmatprep.subr.bf16.mxu1 %v3326_v20  ;;  %v3390_v19 = vld [vmem:[#allocation7 + $0x208] ss:$16 sps:$4 sm:$0xff]   ;;  %v3395_v20 = vld [vmem:[#allocation7 + $0x1ec] ss:$16 sps:$4 sm:$0xff]  }
  0xa0   :  { %1228 = vmatpush2.bf16.msra.mxu0 %v3321_v21  ;;  %1271 = vmatpush2.bf16.msra.mxu1 %v3324_v22  ;;  %v3398_v21 = vld [vmem:[#allocation7 + $0x3ec] ss:$16 sps:$4 sm:$0xff]   ;;  %v3393_v22 = vld [vmem:[#allocation7 + $0x1e8] ss:$16 sps:$4 sm:$0xff]  }
  0xa1   :  { %1229 = vmatprep.subr.bf16.mxu0 %v3329_v23  ;;  %1272 = vmatprep.subr.bf16.mxu1 %v3332_v24  ;;  %v3396_v23 = vld [vmem:[#allocation7 + $0x3e8] ss:$16 sps:$4 sm:$0xff]   ;;  %v3401_v24 = vld [vmem:[#allocation7 + $0x1cc] ss:$16 sps:$4 sm:$0xff]  }
  0xa4   :  { %1230 = vmatpush2.bf16.msra.mxu0 %v3327_v25  ;;  %1273 = vmatpush2.bf16.msra.mxu1 %v3330_v26  ;;  %v3404_v25 = vld [vmem:[#allocation7 + $0x3cc] ss:$16 sps:$4 sm:$0xff]   ;;  %v3399_v26 = vld [vmem:[#allocation7 + $0x1c8] ss:$16 sps:$4 sm:$0xff]  }
  0xa5   :  { %1231 = vmatprep.subr.bf16.mxu0 %v3335_v27  ;;  %1274 = vmatprep.subr.bf16.mxu1 %v3338_v28  ;;  %v3402_v27 = vld [vmem:[#allocation7 + $0x3c8] ss:$16 sps:$4 sm:$0xff]   ;;  %v3407_v28 = vld [vmem:[#allocation7 + $0x1ac] ss:$16 sps:$4 sm:$0xff]  }
  0xa8   :  { %1232 = vmatpush2.bf16.msra.mxu0 %v3333_v29  ;;  %1275 = vmatpush2.bf16.msra.mxu1 %v3336_v30  ;;  %v3410_v29 = vld [vmem:[#allocation7 + $0x3ac] ss:$16 sps:$4 sm:$0xff]   ;;  %v3405_v30 = vld [vmem:[#allocation7 + $0x1a8] ss:$16 sps:$4 sm:$0xff]  }
  0xa9   :  { %1233 = vmatprep.subr.bf16.mxu0 %v3341_v31  ;;  %1276 = vmatprep.subr.bf16.mxu1 %v3344_v32  ;;  %v3408_v31 = vld [vmem:[#allocation7 + $0x3a8] ss:$16 sps:$4 sm:$0xff]   ;;  %v3413_v32 = vld [vmem:[#allocation7 + $0x18c] ss:$16 sps:$4 sm:$0xff]  }
  0xac   :  { %1234 = vmatpush2.bf16.msra.mxu0 %v3339_v33  ;;  %1277 = vmatpush2.bf16.msra.mxu1 %v3342_v34  ;;  %v3416_v33 = vld [vmem:[#allocation7 + $0x38c] ss:$16 sps:$4 sm:$0xff]   ;;  %v3411_v34 = vld [vmem:[#allocation7 + $0x188] ss:$16 sps:$4 sm:$0xff]  }
  0xad   :  { %1289 = vmatprep.subr.bf16.mxu0 %v3347_v35  ;;  %1332 = vmatprep.subr.bf16.mxu1 %v3350_v36  ;;  %v3414_v35 = vld [vmem:[#allocation7 + $0x388] ss:$16 sps:$4 sm:$0xff]   ;;  %v3419_v36 = vld [vmem:[#allocation7 + $0x16c] ss:$16 sps:$4 sm:$0xff]  }
 0x12f   :  { %v353_v37 = vpop.f32.mrf.mxu0  ;;  %v396_v38 = vpop.f32.mrf.mxu1 }
 0x131   :  { %v355_v39 = vpop.f32.mrf.mxu0  ;;  %v398_v40 = vpop.f32.mrf.mxu1 }
 0x133   :  { %v357_v41 = vpop.f32.mrf.mxu0  ;;  %v400_v42 = vpop.f32.mrf.mxu1 }
 0x134   :  { %v405_v43 = vpack.c.bf16 %v357_v41, %v353_v37  ;;  %v407_v44 = vpack.c.bf16 %v400_v42, %v396_v38  ;;  %v3422_v37 = vld [vmem:[#allocation7 + $0x36c] ss:$16 sps:$4 sm:$0xff]   ;;  %v3417_v38 = vld [vmem:[#allocation7 + $0x168] ss:$16 sps:$4 sm:$0xff]  }
 0x135   :  { %v359_v45 = vpop.f32.mrf.mxu0  ;;  %v402_v46 = vpop.f32.mrf.mxu1  ;;  %v3428_v41 = vld [vmem:[#allocation7 + $0x34c] ss:$16 sps:$4 sm:$0xff]   ;;  %v3423_v42 = vld [vmem:[#allocation7 + $0x148] ss:$16 sps:$4 sm:$0xff]  }
 0x136   :  { %v406_v47 = vpack.c.bf16 %v359_v45, %v355_v39  ;;  %v408_v48 = vpack.c.bf16 %v402_v46, %v398_v40  ;;  %v3951_v53 = vmax.bf16 %v3857_v0, %v405_v43  ;;  %v3954_v54 = vmax.bf16 %v3857_v0, %v407_v44  ;;  %v3420_v39 = vld [vmem:[#allocation7 + $0x368] ss:$16 sps:$4 sm:$0xff]   ;;  %v3425_v40 = vld [vmem:[#allocation7 + $0x14c] ss:$16 sps:$4 sm:$0xff]  }
 0x137   :  { %v3426_v43 = vld [vmem:[#allocation7 + $0x348] ss:$16 sps:$4 sm:$0xff]   ;;  %v3431_v44 = vld [vmem:[#allocation7 + $0x12c] ss:$16 sps:$4 sm:$0xff]  }
 0x138   :  { %v410_v49 = vmax.bf16 %v3857_v0, %v406_v47  ;;  %v412_v50 = vmax.bf16 %v3857_v0, %v408_v48  ;;  %v3434_v45 = vld [vmem:[#allocation7 + $0x32c] ss:$16 sps:$4 sm:$0xff]   ;;  %v3429_v46 = vld [vmem:[#allocation7 + $0x128] ss:$16 sps:$4 sm:$0xff]  }
 0x139   :  { %v3432_v47 = vld [vmem:[#allocation7 + $0x328] ss:$16 sps:$4 sm:$0xff]   ;;  %v3437_v48 = vld [vmem:[#allocation7 + $0x10c] ss:$16 sps:$4 sm:$0xff]  }
 0x13a   :  { %1235 = vmatprep.mubr.bf16.mxu0 %v410_v49  ;;  %1278 = vmatprep.mubr.bf16.mxu1 %v412_v50 }
 0x13b   :  { %1236 = vmatmul.mubr.bf16.vlgmr.msra.gmra.mxu0 %v3951_v53  ;;  %1279 = vmatmul.mubr.bf16.vlgmr.msra.gmra.mxu1 %v3954_v54 }
 0x13c   :  { %1290 = vmatpush1.bf16.msra.mxu0 %v3345_v51  ;;  %1333 = vmatpush1.bf16.msra.mxu1 %v3348_v52  ;;  %v3438_v51 = vld [vmem:[#allocation7 + $0x308] ss:$16 sps:$4 sm:$0xff]   ;;  %v3443_v52 = vld [vmem:[#allocation8 + $0xe4] ss:$16 sps:$4 sm:$0xff]  }
 0x13d   :  { %1321 = vmatprep.mubr.bf16.mxu0 %v410_v49  ;;  %1364 = vmatprep.mubr.bf16.mxu1 %v412_v50  ;;  %v3440_v49 = vld [vmem:[#allocation7 + $0x30c] ss:$16 sps:$4 sm:$0xff]   ;;  %v3435_v50 = vld [vmem:[#allocation7 + $0x108] ss:$16 sps:$4 sm:$0xff]  }
 0x13e   :  { %1291 = vmatprep.subr.bf16.mxu0 %v3353_v55  ;;  %1334 = vmatprep.subr.bf16.mxu1 %v3356_v56  ;;  %v3441_v55 = vld [vmem:[#allocation8 + $0xe0] ss:$16 sps:$4 sm:$0xff]   ;;  %v3446_v56 = vld [vmem:[#allocation8 + $0xc4] ss:$16 sps:$4 sm:$0xff]  }
 0x140   :  { %1292 = vmatpush1.bf16.msra.mxu0 %v3351_v57  ;;  %1335 = vmatpush1.bf16.msra.mxu1 %v3354_v58  ;;  %v3444_v57 = vld [vmem:[#allocation8 + $0xc0] ss:$16 sps:$4 sm:$0xff]   ;;  %v3449_v58 = vld [vmem:[#allocation8 + $0xa4] ss:$16 sps:$4 sm:$0xff]  }
 0x141   :  { %1293 = vmatprep.subr.bf16.mxu0 %v3359_v59  ;;  %1336 = vmatprep.subr.bf16.mxu1 %v3362_v60  ;;  %v3447_v59 = vld [vmem:[#allocation8 + $0xa0] ss:$16 sps:$4 sm:$0xff]   ;;  %v3452_v60 = vld [vmem:[#allocation8 + $0x84] ss:$16 sps:$4 sm:$0xff]  }
 0x144   :  { %1294 = vmatpush1.bf16.msra.mxu0 %v3357_v61  ;;  %1337 = vmatpush1.bf16.msra.mxu1 %v3360_v62  ;;  %v3450_v61 = vld [vmem:[#allocation8 + $0x80] ss:$16 sps:$4 sm:$0xff]   ;;  %v3455_v62 = vld [vmem:[#allocation8 + $0x64] ss:$16 sps:$4 sm:$0xff]  }
 0x145   :  { %1295 = vmatprep.subr.bf16.mxu0 %v3365_v63  ;;  %1338 = vmatprep.subr.bf16.mxu1 %v3368_v1  ;;  %v3489_v63 = vld [vmem:[#allocation8 + $0x2e0] ss:$16 sps:$4 sm:$0xff]   ;;  %v3491_v1 = vld [vmem:[#allocation8 + $0x2e4] ss:$16 sps:$4 sm:$0xff]  }
 0x148   :  { %1296 = vmatpush1.bf16.msra.mxu0 %v3363_v2  ;;  %1339 = vmatpush1.bf16.msra.mxu1 %v3366_v3  ;;  %v3453_v2 = vld [vmem:[#allocation8 + $0x60] ss:$16 sps:$4 sm:$0xff]  }
 0x149   :  { %1297 = vmatprep.subr.bf16.mxu0 %v3371_v4  ;;  %1340 = vmatprep.subr.bf16.mxu1 %v3374_v5  ;;  %v3495_v3 = vld [vmem:[#allocation8 + $0x2c0] ss:$16 sps:$4 sm:$0xff]   ;;  %v3497_v4 = vld [vmem:[#allocation8 + $0x2c4] ss:$16 sps:$4 sm:$0xff]  }
 0x14a   :  { %v3461_v5 = vld [vmem:[#allocation8 + $0x24] ss:$16 sps:$4 sm:$0xff]  }
 0x14c   :  { %1298 = vmatpush1.bf16.msra.mxu0 %v3369_v6  ;;  %1341 = vmatpush1.bf16.msra.mxu1 %v3372_v7  ;;  %v3459_v6 = vld [vmem:[#allocation8 + $0x20] ss:$16 sps:$4 sm:$0xff]  }
 0x14d   :  { %1299 = vmatprep.subr.bf16.mxu0 %v3377_v8  ;;  %1342 = vmatprep.subr.bf16.mxu1 %v3380_v9  ;;  %v3501_v7 = vld [vmem:[#allocation8 + $0x2a0] ss:$16 sps:$4 sm:$0xff]   ;;  %v3503_v8 = vld [vmem:[#allocation8 + $0x2a4] ss:$16 sps:$4 sm:$0xff]  }
 0x14e   :  { %v3464_v9 = vld [vmem:[#allocation8 + $0x4] ss:$16 sps:$4 sm:$0xff]  }
 0x150   :  { %1300 = vmatpush1.bf16.msra.mxu0 %v3375_v10  ;;  %1343 = vmatpush1.bf16.msra.mxu1 %v3378_v11  ;;  %v3462_v10 = vld [vmem:[#allocation8] ss:$16 sps:$4 sm:$0xff]  }
 0x151   :  { %1301 = vmatprep.subr.bf16.mxu0 %v3383_v12  ;;  %1344 = vmatprep.subr.bf16.mxu1 %v3386_v13  ;;  %v3507_v11 = vld [vmem:[#allocation8 + $0x280] ss:$16 sps:$4 sm:$0xff]   ;;  %v3509_v12 = vld [vmem:[#allocation8 + $0x284] ss:$16 sps:$4 sm:$0xff]  }
 0x152   :  { %v3467_v13 = vld [vmem:[#allocation8 + $0x1e4] ss:$16 sps:$4 sm:$0xff]  }
 0x154   :  { %1302 = vmatpush1.bf16.msra.mxu0 %v3381_v14  ;;  %1345 = vmatpush1.bf16.msra.mxu1 %v3384_v15  ;;  %v3465_v14 = vld [vmem:[#allocation8 + $0x1e0] ss:$16 sps:$4 sm:$0xff]  }
 0x155   :  { %1303 = vmatprep.subr.bf16.mxu0 %v3389_v16  ;;  %1346 = vmatprep.subr.bf16.mxu1 %v3392_v17  ;;  %v3513_v15 = vld [vmem:[#allocation8 + $0x260] ss:$16 sps:$4 sm:$0xff]   ;;  %v3515_v16 = vld [vmem:[#allocation8 + $0x264] ss:$16 sps:$4 sm:$0xff]  }
 0x156   :  { %v3470_v17 = vld [vmem:[#allocation8 + $0x1c4] ss:$16 sps:$4 sm:$0xff]  }
 0x158   :  { %1304 = vmatpush1.bf16.msra.mxu0 %v3387_v18  ;;  %1347 = vmatpush1.bf16.msra.mxu1 %v3390_v19  ;;  %v3468_v18 = vld [vmem:[#allocation8 + $0x1c0] ss:$16 sps:$4 sm:$0xff]  }
 0x159   :  { %1305 = vmatprep.subr.bf16.mxu0 %v3395_v20  ;;  %1348 = vmatprep.subr.bf16.mxu1 %v3398_v21  ;;  %v3519_v19 = vld [vmem:[#allocation8 + $0x240] ss:$16 sps:$4 sm:$0xff]   ;;  %v3521_v20 = vld [vmem:[#allocation8 + $0x244] ss:$16 sps:$4 sm:$0xff]  }
 0x15a   :  { %v3473_v21 = vld [vmem:[#allocation8 + $0x1a4] ss:$16 sps:$4 sm:$0xff]  }
 0x15c   :  { %1306 = vmatpush2.bf16.msra.mxu0 %v3393_v22  ;;  %1349 = vmatpush2.bf16.msra.mxu1 %v3396_v23  ;;  %v3471_v22 = vld [vmem:[#allocation8 + $0x1a0] ss:$16 sps:$4 sm:$0xff]  }
 0x15d   :  { %1307 = vmatprep.subr.bf16.mxu0 %v3401_v24  ;;  %1350 = vmatprep.subr.bf16.mxu1 %v3404_v25  ;;  %v3525_v23 = vld [vmem:[#allocation8 + $0x220] ss:$16 sps:$4 sm:$0xff]   ;;  %v3527_v24 = vld [vmem:[#allocation8 + $0x224] ss:$16 sps:$4 sm:$0xff]  }
 0x15e   :  { %v3476_v25 = vld [vmem:[#allocation8 + $0x184] ss:$16 sps:$4 sm:$0xff]  }
 0x160   :  { %1308 = vmatpush2.bf16.msra.mxu0 %v3399_v26  ;;  %1351 = vmatpush2.bf16.msra.mxu1 %v3402_v27  ;;  %v3474_v26 = vld [vmem:[#allocation8 + $0x180] ss:$16 sps:$4 sm:$0xff]  }
 0x161   :  { %1309 = vmatprep.subr.bf16.mxu0 %v3407_v28  ;;  %1352 = vmatprep.subr.bf16.mxu1 %v3410_v29  ;;  %v3531_v27 = vld [vmem:[#allocation8 + $0x200] ss:$16 sps:$4 sm:$0xff]   ;;  %v3533_v28 = vld [vmem:[#allocation8 + $0x204] ss:$16 sps:$4 sm:$0xff]  }
 0x162   :  { %v3479_v29 = vld [vmem:[#allocation8 + $0x164] ss:$16 sps:$4 sm:$0xff]  }
 0x164   :  { %1310 = vmatpush2.bf16.msra.mxu0 %v3405_v30  ;;  %1353 = vmatpush2.bf16.msra.mxu1 %v3408_v31  ;;  %v3477_v30 = vld [vmem:[#allocation8 + $0x160] ss:$16 sps:$4 sm:$0xff]  }
 0x165   :  { %1311 = vmatprep.subr.bf16.mxu0 %v3413_v32  ;;  %1354 = vmatprep.subr.bf16.mxu1 %v3416_v33  ;;  %v3537_v31 = vld [vmem:[#allocation8 + $0x3e0] ss:$16 sps:$4 sm:$0xff]   ;;  %v3539_v32 = vld [vmem:[#allocation8 + $0x3e4] ss:$16 sps:$4 sm:$0xff]  }
 0x166   :  { %v3482_v33 = vld [vmem:[#allocation8 + $0x144] ss:$16 sps:$4 sm:$0xff]  }
 0x168   :  { %1312 = vmatpush2.bf16.msra.mxu0 %v3411_v34  ;;  %1355 = vmatpush2.bf16.msra.mxu1 %v3414_v35  ;;  %v3480_v34 = vld [vmem:[#allocation8 + $0x140] ss:$16 sps:$4 sm:$0xff]  }
 0x169   :  { %1313 = vmatprep.subr.bf16.mxu0 %v3419_v36  ;;  %1356 = vmatprep.subr.bf16.mxu1 %v3422_v37  ;;  %v3543_v35 = vld [vmem:[#allocation8 + $0x3c0] ss:$16 sps:$4 sm:$0xff]   ;;  %v3545_v36 = vld [vmem:[#allocation8 + $0x3c4] ss:$16 sps:$4 sm:$0xff]  }
 0x16a   :  { %v3485_v37 = vld [vmem:[#allocation8 + $0x124] ss:$16 sps:$4 sm:$0xff]  }
 0x16c   :  { %1314 = vmatpush2.bf16.msra.mxu0 %v3417_v38  ;;  %1357 = vmatpush2.bf16.msra.mxu1 %v3420_v39  ;;  %v3483_v38 = vld [vmem:[#allocation8 + $0x120] ss:$16 sps:$4 sm:$0xff]  }
 0x16d   :  { %1315 = vmatprep.subr.bf16.mxu0 %v3425_v40  ;;  %1358 = vmatprep.subr.bf16.mxu1 %v3428_v41  ;;  %v3549_v39 = vld [vmem:[#allocation8 + $0x3a0] ss:$16 sps:$4 sm:$0xff]   ;;  %v3551_v40 = vld [vmem:[#allocation8 + $0x3a4] ss:$16 sps:$4 sm:$0xff]  }
 0x16e   :  { %v3488_v41 = vld [vmem:[#allocation8 + $0x104] ss:$16 sps:$4 sm:$0xff]  }
 0x170   :  { %1316 = vmatpush2.bf16.msra.mxu0 %v3423_v42  ;;  %1359 = vmatpush2.bf16.msra.mxu1 %v3426_v43  ;;  %v3486_v42 = vld [vmem:[#allocation8 + $0x100] ss:$16 sps:$4 sm:$0xff]  }
 0x171   :  { %1317 = vmatprep.subr.bf16.mxu0 %v3431_v44  ;;  %1360 = vmatprep.subr.bf16.mxu1 %v3434_v45  ;;  %v3555_v43 = vld [vmem:[#allocation8 + $0x380] ss:$16 sps:$4 sm:$0xff]   ;;  %v3557_v44 = vld [vmem:[#allocation8 + $0x384] ss:$16 sps:$4 sm:$0xff]   ;;  %v3494_v45 = vld [vmem:[#allocation8 + $0xec] ss:$16 sps:$4 sm:$0xff]  }
 0x174   :  { %1318 = vmatpush2.bf16.msra.mxu0 %v3429_v46  ;;  %1361 = vmatpush2.bf16.msra.mxu1 %v3432_v47  ;;  %v3561_v46 = vld [vmem:[#allocation8 + $0x360] ss:$16 sps:$4 sm:$0xff]   ;;  %v3563_v47 = vld [vmem:[#allocation8 + $0x364] ss:$16 sps:$4 sm:$0xff]  }
 0x175   :  { %1319 = vmatprep.subr.bf16.mxu0 %v3437_v48  ;;  %1362 = vmatprep.subr.bf16.mxu1 %v3440_v49  ;;  %v3569_v48 = vld [vmem:[#allocation8 + $0x344] ss:$16 sps:$4 sm:$0xff]   ;;  %v3567_v49 = vld [vmem:[#allocation8 + $0x340] ss:$16 sps:$4 sm:$0xff]  }
 0x178   :  { %1320 = vmatpush2.bf16.msra.mxu0 %v3435_v50  ;;  %1363 = vmatpush2.bf16.msra.mxu1 %v3438_v51  ;;  %v3575_v50 = vld [vmem:[#allocation8 + $0x324] ss:$16 sps:$4 sm:$0xff]   ;;  %v3573_v51 = vld [vmem:[#allocation8 + $0x320] ss:$16 sps:$4 sm:$0xff]  }
 0x179   :  { %2173 = vmatprep.subr.bf16.mxu0 %v3443_v52  ;;  %2216 = vmatprep.subr.bf16.mxu1 %v3491_v1  ;;  %v3581_v52 = vld [vmem:[#allocation8 + $0x304] ss:$16 sps:$4 sm:$0xff]  }
 0x17b   :  { %1322 = vmatmul.mubr.bf16.vlgmr.msra.gmra.mxu0 %v3951_v53  ;;  %1365 = vmatmul.mubr.bf16.vlgmr.msra.gmra.mxu1 %v3954_v54  ;;  %v3458_v53 = vld [vmem:[#allocation8 + $0x44] ss:$16 sps:$4 sm:$0xff]   ;;  %v3456_v54 = vld [vmem:[#allocation8 + $0x40] ss:$16 sps:$4 sm:$0xff]  }
 0x17c   :  { %2174 = vmatpush1.bf16.msra.mxu0 %v3441_v55  ;;  %2217 = vmatpush1.bf16.msra.mxu1 %v3489_v63  ;;  %v3579_v55 = vld [vmem:[#allocation8 + $0x300] ss:$16 sps:$4 sm:$0xff]  }
 0x17d   :  { %2175 = vmatprep.subr.bf16.mxu0 %v3446_v56  ;;  %2218 = vmatprep.subr.bf16.mxu1 %v3497_v4  ;;  %v3587_v56 = vld [vmem:[#allocation8 + $0x2ec] ss:$16 sps:$4 sm:$0xff]  }
 0x180   :  { %2176 = vmatpush1.bf16.msra.mxu0 %v3444_v57  ;;  %2219 = vmatpush1.bf16.msra.mxu1 %v3495_v3  ;;  %v543_v57 = vlaneseq }
 0x181   :  { %2177 = vmatprep.subr.bf16.mxu0 %v3449_v58  ;;  %2220 = vmatprep.subr.bf16.mxu1 %v3503_v8 }
 0x182   :  { %v3961_v58 = vshrl.u32 %v543_v57, 7 }
 0x184   :  { %2178 = vmatpush1.bf16.msra.mxu0 %v3447_v59  ;;  %2221 = vmatpush1.bf16.msra.mxu1 %v3501_v7  ;;  %v545_v59 = vsub.s32 0, %v3961_v58 }
 0x185   :  { %2179 = vmatprep.subr.bf16.mxu0 %v3452_v60  ;;  %2222 = vmatprep.subr.bf16.mxu1 %v3509_v12  ;;  %v3967_v60 = vld [vmem:[%s4038_s3] sm:$0xf] }
 0x188   :  { %2180 = vmatpush1.bf16.msra.mxu0 %v3450_v61  ;;  %2223 = vmatpush1.bf16.msra.mxu1 %v3507_v11  ;;  %v549_v61 = vsub.s32 1, %v3961_v58 }
 0x189   :  { %2181 = vmatprep.subr.bf16.mxu0 %v3455_v62  ;;  %2224 = vmatprep.subr.bf16.mxu1 %v3515_v16  ;;  %v546_v62 = vrot.slane %v3967_v60, %v545_v59 }
 0x18c   :  { %2182 = vmatpush1.bf16.msra.mxu0 %v3453_v2  ;;  %2225 = vmatpush1.bf16.msra.mxu1 %v3513_v15  ;;  %v550_v2 = vrot.slane %v3967_v60, %v549_v61 }
 0x18d   :  { %2183 = vmatprep.subr.bf16.mxu0 %v3458_v53  ;;  %2226 = vmatprep.subr.bf16.mxu1 %v3521_v20  ;;  %v3500_v20 = vld [vmem:[#allocation8 + $0xcc] ss:$16 sps:$4 sm:$0xff]  }
 0x190   :  { %2184 = vmatpush1.bf16.msra.mxu0 %v3456_v54  ;;  %2227 = vmatpush1.bf16.msra.mxu1 %v3519_v19 }
 0x191   :  { %2185 = vmatprep.subr.bf16.mxu0 %v3461_v5  ;;  %2228 = vmatprep.subr.bf16.mxu1 %v3527_v24  ;;  %v3512_v24 = vld [vmem:[#allocation8 + $0x8c] ss:$16 sps:$4 sm:$0xff]  }
 0x194   :  { %2186 = vmatpush1.bf16.msra.mxu0 %v3459_v6  ;;  %2229 = vmatpush1.bf16.msra.mxu1 %v3525_v23  ;;  %v3504_v23 = vld [vmem:[#allocation8 + $0xa8] ss:$16 sps:$4 sm:$0xff]  }
 0x195   :  { %2187 = vmatprep.subr.bf16.mxu0 %v3464_v9  ;;  %2230 = vmatprep.subr.bf16.mxu1 %v3533_v28  ;;  %v3524_v28 = vld [vmem:[#allocation8 + $0x4c] ss:$16 sps:$4 sm:$0xff]  }
 0x198   :  { %2188 = vmatpush1.bf16.msra.mxu0 %v3462_v10  ;;  %2231 = vmatpush1.bf16.msra.mxu1 %v3531_v27  ;;  %v3516_v27 = vld [vmem:[#allocation8 + $0x68] ss:$16 sps:$4 sm:$0xff]  }
 0x199   :  { %2189 = vmatprep.subr.bf16.mxu0 %v3467_v13  ;;  %2232 = vmatprep.subr.bf16.mxu1 %v3539_v32  ;;  %v3536_v32 = vld [vmem:[#allocation8 + $0xc] ss:$16 sps:$4 sm:$0xff]  }
 0x19c   :  { %2190 = vmatpush2.bf16.msra.mxu0 %v3465_v14  ;;  %2233 = vmatpush2.bf16.msra.mxu1 %v3537_v31  ;;  %v3528_v31 = vld [vmem:[#allocation8 + $0x28] ss:$16 sps:$4 sm:$0xff]  }
 0x19d   :  { %2191 = vmatprep.subr.bf16.mxu0 %v3470_v17  ;;  %2234 = vmatprep.subr.bf16.mxu1 %v3545_v36  ;;  %v3548_v36 = vld [vmem:[#allocation8 + $0x1cc] ss:$16 sps:$4 sm:$0xff]  }
 0x1a0   :  { %2192 = vmatpush2.bf16.msra.mxu0 %v3468_v18  ;;  %2235 = vmatpush2.bf16.msra.mxu1 %v3543_v35  ;;  %v3492_v18 = vld [vmem:[#allocation8 + $0xe8] ss:$16 sps:$4 sm:$0xff]  }
 0x1a1   :  { %2193 = vmatprep.subr.bf16.mxu0 %v3473_v21  ;;  %2236 = vmatprep.subr.bf16.mxu1 %v3551_v40  ;;  %v3498_v21 = vld [vmem:[#allocation8 + $0xc8] ss:$16 sps:$4 sm:$0xff]   ;;  %v3560_v40 = vld [vmem:[#allocation8 + $0x18c] ss:$16 sps:$4 sm:$0xff]  }
 0x1a2   :  { %v3540_v35 = vld [vmem:[#allocation8 + $0x1e8] ss:$16 sps:$4 sm:$0xff]  }
 0x1a4   :  { %2194 = vmatpush2.bf16.msra.mxu0 %v3471_v22  ;;  %2237 = vmatpush2.bf16.msra.mxu1 %v3549_v39  ;;  %v3506_v22 = vld [vmem:[#allocation8 + $0xac] ss:$16 sps:$4 sm:$0xff]   ;;  %v3552_v39 = vld [vmem:[#allocation8 + $0x1a8] ss:$16 sps:$4 sm:$0xff]  }
 0x1a5   :  { %2195 = vmatprep.subr.bf16.mxu0 %v3476_v25  ;;  %2238 = vmatprep.subr.bf16.mxu1 %v3557_v44  ;;  %v3510_v25 = vld [vmem:[#allocation8 + $0x88] ss:$16 sps:$4 sm:$0xff]  }
 0x1a6   :  { %v3564_v44 = vld [vmem:[#allocation8 + $0x168] ss:$16 sps:$4 sm:$0xff]  }
 0x1a8   :  { %2196 = vmatpush2.bf16.msra.mxu0 %v3474_v26  ;;  %2239 = vmatpush2.bf16.msra.mxu1 %v3555_v43  ;;  %v3518_v26 = vld [vmem:[#allocation8 + $0x6c] ss:$16 sps:$4 sm:$0xff]   ;;  %v553_v43 = vsub.s32 2, %v3961_v58 }
 0x1a9   :  { %2197 = vmatprep.subr.bf16.mxu0 %v3479_v29  ;;  %2240 = vmatprep.subr.bf16.mxu1 %v3563_v47  ;;  %v3522_v29 = vld [vmem:[#allocation8 + $0x48] ss:$16 sps:$4 sm:$0xff]  }
 0x1aa   :  { %v554_v47 = vrot.slane %v3967_v60, %v553_v43 }
 0x1ac   :  { %2198 = vmatpush2.bf16.msra.mxu0 %v3477_v30  ;;  %2241 = vmatpush2.bf16.msra.mxu1 %v3561_v46  ;;  %v3530_v30 = vld [vmem:[#allocation8 + $0x2c] ss:$16 sps:$4 sm:$0xff]  }
 0x1ad   :  { %2199 = vmatprep.subr.bf16.mxu0 %v3482_v33  ;;  %2242 = vmatprep.subr.bf16.mxu1 %v3569_v48  ;;  %v3534_v33 = vld [vmem:[#allocation8 + $0x8] ss:$16 sps:$4 sm:$0xff]   ;;  %v3572_v46 = vld [vmem:[#allocation8 + $0x14c] ss:$16 sps:$4 sm:$0xff]  }
 0x1b0   :  { %2200 = vmatpush2.bf16.msra.mxu0 %v3480_v34  ;;  %2243 = vmatpush2.bf16.msra.mxu1 %v3567_v49  ;;  %v3542_v34 = vld [vmem:[#allocation8 + $0x1ec] ss:$16 sps:$4 sm:$0xff]  }
 0x1b1   :  { %2201 = vmatprep.subr.bf16.mxu0 %v3485_v37  ;;  %2244 = vmatprep.subr.bf16.mxu1 %v3575_v50  ;;  %v3546_v37 = vld [vmem:[#allocation8 + $0x1c8] ss:$16 sps:$4 sm:$0xff]  }
 0x1b4   :  { %2202 = vmatpush2.bf16.msra.mxu0 %v3483_v38  ;;  %2245 = vmatpush2.bf16.msra.mxu1 %v3573_v51  ;;  %v3554_v38 = vld [vmem:[#allocation8 + $0x1ac] ss:$16 sps:$4 sm:$0xff]   ;;  %v3570_v51 = vld [vmem:[#allocation8 + $0x148] ss:$16 sps:$4 sm:$0xff]  }
 0x1b5   :  { %2203 = vmatprep.subr.bf16.mxu0 %v3488_v41  ;;  %2246 = vmatprep.subr.bf16.mxu1 %v3581_v52  ;;  %v3558_v41 = vld [vmem:[#allocation8 + $0x188] ss:$16 sps:$4 sm:$0xff]  }
 0x1b8   :  { %2204 = vmatpush2.bf16.msra.mxu0 %v3486_v42  ;;  %2247 = vmatpush2.bf16.msra.mxu1 %v3579_v55  ;;  %v3566_v42 = vld [vmem:[#allocation8 + $0x16c] ss:$16 sps:$4 sm:$0xff]  }
 0x1b9   :  { %2259 = vmatprep.subr.bf16.mxu0 %v3494_v45  ;;  %2302 = vmatprep.subr.bf16.mxu1 %v3587_v56  ;;  %v557_v45 = vsub.s32 3, %v3961_v58  ;;  %v3578_v56 = vld [vmem:[#allocation8 + $0x12c] ss:$16 sps:$4 sm:$0xff]  }
 0x1bb   :  { %v558_v50 = vrot.slane %v3967_v60, %v557_v45 }
 0x1fb   :  { %v1237_v63 = vpop.f32.mrf.mxu0  ;;  %v1280_v1 = vpop.f32.mrf.mxu1 }
 0x1fc   :  { %v1238_v3 = vadd.f32 %v1237_v63, %v546_v62 }
 0x1fd   :  { %v1239_v53 = vpop.f32.mrf.mxu0  ;;  %v1282_v54 = vpop.f32.mrf.mxu1 }
 0x1fe   :  { %v1240_v6 = vadd.f32 %v1239_v53, %v550_v2  ;;  %v1281_v11 = vadd.f32 %v1280_v1, %v1238_v3 }
 0x1ff   :  { %v1241_v4 = vpop.f32.mrf.mxu0  ;;  %v1284_v5 = vpop.f32.mrf.mxu1 }
 0x200   :  { %v1242_v7 = vadd.f32 %v1241_v4, %v546_v62  ;;  %v1283_v13 = vadd.f32 %v1282_v54, %v1240_v6  ;;  %v3576_v54 = vld [vmem:[#allocation8 + $0x128] ss:$16 sps:$4 sm:$0xff]   ;;  %v3584_v4 = vld [vmem:[#allocation8 + $0x10c] ss:$16 sps:$4 sm:$0xff]  }
 0x201   :  { %v1243_v8 = vpop.f32.mrf.mxu0  ;;  %v1286_v12 = vpop.f32.mrf.mxu1 }
 0x202   :  { %v1285_v9 = vadd.f32 %v1284_v5, %v1242_v7  ;;  %v1244_v10 = vadd.f32 %v1243_v8, %v550_v2 }
 0x204   :  { %v1287_v14 = vadd.f32 %v1286_v12, %v1244_v10  ;;  %v1375_v15 = vpack.c.bf16 %v1285_v9, %v1281_v11  ;;  %v3582_v10 = vld [vmem:[#allocation8 + $0x108] ss:$16 sps:$4 sm:$0xff]  }
 0x206   :  { %v1376_v16 = vpack.c.bf16 %v1287_v14, %v1283_v13  ;;  %v3978_v19 = vmax.bf16 %v3857_v0, %v1375_v15  ;;  %v3585_v14 = vld [vmem:[#allocation8 + $0x2e8] ss:$16 sps:$4 sm:$0xff]  }
 0x208   :  { %v1380_v17 = vmax.bf16 %v3857_v0, %v1376_v16  ;;  %v3590_v16 = vld [vmem:[#allocation8 + $0x2cc] ss:$16 sps:$4 sm:$0xff]  }
 0x20a   :  { %2205 = vmatprep.mubr.bf16.mxu0 %v1380_v17 }
 0x20b   :  { %2206 = vmatmul.mubr.bf16.vlgmr.msra.gmra.mxu0 %v3978_v19 }
 0x20c   :  { %2260 = vmatpush1.bf16.msra.mxu0 %v3492_v18  ;;  %2291 = vmatprep.mubr.bf16.mxu0 %v1380_v17  ;;  %v3588_v17 = vld [vmem:[#allocation8 + $0x2c8] ss:$16 sps:$4 sm:$0xff]   ;;  %v3593_v18 = vld [vmem:[#allocation8 + $0x2ac] ss:$16 sps:$4 sm:$0xff]  }
 0x20d   :  { %2261 = vmatprep.subr.bf16.mxu0 %v3500_v20  ;;  %v3591_v20 = vld [vmem:[#allocation8 + $0x2a8] ss:$16 sps:$4 sm:$0xff]  }
 0x210   :  { %2262 = vmatpush1.bf16.msra.mxu0 %v3498_v21  ;;  %v3596_v21 = vld [vmem:[#allocation8 + $0x28c] ss:$16 sps:$4 sm:$0xff]  }
 0x211   :  { %2263 = vmatprep.subr.bf16.mxu0 %v3506_v22  ;;  %v3633_v22 = vld [vmem:[#allocation10 + $0x78] sm:$0xff]  }
 0x214   :  { %2264 = vmatpush1.bf16.msra.mxu0 %v3504_v23  ;;  %v3634_v23 = vld [vmem:[#allocation10 + $0x38] sm:$0xff]  }
 0x215   :  { %2265 = vmatprep.subr.bf16.mxu0 %v3512_v24  ;;  %v3635_v24 = vld [vmem:[#allocation10 + $0x70] sm:$0xff]  }
 0x218   :  { %2266 = vmatpush1.bf16.msra.mxu0 %v3510_v25  ;;  %v3594_v25 = vld [vmem:[#allocation8 + $0x288] ss:$16 sps:$4 sm:$0xff]  }
 0x219   :  { %2267 = vmatprep.subr.bf16.mxu0 %v3518_v26  ;;  %v3599_v26 = vld [vmem:[#allocation8 + $0x26c] ss:$16 sps:$4 sm:$0xff]  }
 0x21c   :  { %2268 = vmatpush1.bf16.msra.mxu0 %v3516_v27  ;;  %v3636_v27 = vld [vmem:[#allocation10 + $0x30] sm:$0xff]  }
 0x21d   :  { %2269 = vmatprep.subr.bf16.mxu0 %v3524_v28  ;;  %v3597_v28 = vld [vmem:[#allocation8 + $0x268] ss:$16 sps:$4 sm:$0xff]  }
 0x220   :  { %2270 = vmatpush1.bf16.msra.mxu0 %v3522_v29  ;;  %v3602_v29 = vld [vmem:[#allocation8 + $0x24c] ss:$16 sps:$4 sm:$0xff]  }
 0x221   :  { %2271 = vmatprep.subr.bf16.mxu0 %v3530_v30  ;;  %v3638_v30 = vld [vmem:[#allocation10 + $0x28] sm:$0xff]  }
 0x224   :  { %2272 = vmatpush1.bf16.msra.mxu0 %v3528_v31  ;;  %v3639_v31 = vld [vmem:[#allocation10 + $0x60] sm:$0xff]  }
 0x225   :  { %2273 = vmatprep.subr.bf16.mxu0 %v3536_v32  ;;  %v3600_v32 = vld [vmem:[#allocation8 + $0x248] ss:$16 sps:$4 sm:$0xff]  }
 0x228   :  { %2274 = vmatpush1.bf16.msra.mxu0 %v3534_v33  ;;  %v3605_v33 = vld [vmem:[#allocation8 + $0x22c] ss:$16 sps:$4 sm:$0xff]  }
 0x229   :  { %2275 = vmatprep.subr.bf16.mxu0 %v3542_v34  ;;  %v3640_v34 = vld [vmem:[#allocation10 + $0x20] sm:$0xff]  }
 0x22c   :  { %2276 = vmatpush2.bf16.msra.mxu0 %v3540_v35  ;;  %v3641_v35 = vld [vmem:[#allocation10 + $0x58] sm:$0xff]  }
 0x22d   :  { %2277 = vmatprep.subr.bf16.mxu0 %v3548_v36  ;;  %v3603_v36 = vld [vmem:[#allocation8 + $0x228] ss:$16 sps:$4 sm:$0xff]  }
 0x230   :  { %2278 = vmatpush2.bf16.msra.mxu0 %v3546_v37  ;;  %v3608_v37 = vld [vmem:[#allocation8 + $0x20c] ss:$16 sps:$4 sm:$0xff]  }
 0x231   :  { %2279 = vmatprep.subr.bf16.mxu0 %v3554_v38  ;;  %v3642_v38 = vld [vmem:[#allocation10 + $0x18] sm:$0xff]  }
 0x234   :  { %2280 = vmatpush2.bf16.msra.mxu0 %v3552_v39  ;;  %v3606_v39 = vld [vmem:[#allocation8 + $0x208] ss:$16 sps:$4 sm:$0xff]  }
 0x235   :  { %2281 = vmatprep.subr.bf16.mxu0 %v3560_v40  ;;  %v3611_v40 = vld [vmem:[#allocation8 + $0x3ec] ss:$16 sps:$4 sm:$0xff]  }
 0x238   :  { %2282 = vmatpush2.bf16.msra.mxu0 %v3558_v41  ;;  %v3609_v41 = vld [vmem:[#allocation8 + $0x3e8] ss:$16 sps:$4 sm:$0xff]  }
 0x239   :  { %2283 = vmatprep.subr.bf16.mxu0 %v3566_v42  ;;  %v3614_v42 = vld [vmem:[#allocation8 + $0x3cc] ss:$16 sps:$4 sm:$0xff]  }
 0x23b   :  { %v1323_v48 = vpop.f32.mrf.mxu0  ;;  %v1366_v49 = vpop.f32.mrf.mxu1 }
 0x23c   :  { %2284 = vmatpush2.bf16.msra.mxu0 %v3564_v44  ;;  %v1324_v62 = vadd.f32 %v1323_v48, %v554_v47  ;;  %v3612_v44 = vld [vmem:[#allocation8 + $0x3c8] ss:$16 sps:$4 sm:$0xff]   ;;  %v3620_v48 = vld [vmem:[#allocation8 + $0x38c] ss:$16 sps:$4 sm:$0xff]  }
 0x23d   :  { %v1325_v52 = vpop.f32.mrf.mxu0  ;;  %v1368_v55 = vpop.f32.mrf.mxu1  ;;  %2285 = vmatprep.subr.bf16.mxu0 %v3572_v46  ;;  %v3617_v46 = vld [vmem:[#allocation8 + $0x3ac] ss:$16 sps:$4 sm:$0xff]  }
 0x23e   :  { %v1326_v2 = vadd.f32 %v1325_v52, %v558_v50  ;;  %v1367_v7 = vadd.f32 %v1366_v49, %v1324_v62  ;;  %v3618_v49 = vld [vmem:[#allocation8 + $0x388] ss:$16 sps:$4 sm:$0xff]   ;;  %v3626_v52 = vld [vmem:[#allocation8 + $0x34c] ss:$16 sps:$4 sm:$0xff]  }
 0x23f   :  { %v1327_v63 = vpop.f32.mrf.mxu0  ;;  %v1370_v1 = vpop.f32.mrf.mxu1  ;;  %v3627_v62 = vld [vmem:[#allocation8 + $0x328] ss:$16 sps:$4 sm:$0xff]  }
 0x240   :  { %v1328_v53 = vadd.f32 %v1327_v63, %v554_v47  ;;  %2286 = vmatpush2.bf16.msra.mxu0 %v3570_v51  ;;  %v1369_v60 = vadd.f32 %v1368_v55, %v1326_v2  ;;  %v3615_v47 = vld [vmem:[#allocation8 + $0x3a8] ss:$16 sps:$4 sm:$0xff]   ;;  %v3632_v63 = vld [vmem:[#allocation8 + $0x30c] ss:$16 sps:$4 sm:$0xff]   ;;  %v3643_v2 = vld [vmem:[#allocation10 + $0x50] sm:$0xff]  }
 0x241   :  { %v1329_v3 = vpop.f32.mrf.mxu0  ;;  %2287 = vmatprep.subr.bf16.mxu0 %v3578_v56  ;;  %v1372_v8 = vpop.f32.mrf.mxu1  ;;  %v3621_v51 = vld [vmem:[#allocation8 + $0x368] ss:$16 sps:$4 sm:$0xff]   ;;  %v3629_v56 = vld [vmem:[#allocation8 + $0x32c] ss:$16 sps:$4 sm:$0xff]  }
 0x242   :  { %v1371_v5 = vadd.f32 %v1370_v1, %v1328_v53  ;;  %v1330_v6 = vadd.f32 %v1329_v3, %v558_v50  ;;  %v3623_v50 = vld [vmem:[#allocation8 + $0x36c] ss:$16 sps:$4 sm:$0xff]   ;;  %v3624_v55 = vld [vmem:[#allocation8 + $0x348] ss:$16 sps:$4 sm:$0xff]   ;;  %v3644_v53 = vld [vmem:[#allocation10 + $0x10] sm:$0xff]  }
 0x243   :  { %v3630_v1 = vld [vmem:[#allocation8 + $0x308] ss:$16 sps:$4 sm:$0xff]  }
 0x244   :  { %v1373_v9 = vadd.f32 %v1372_v8, %v1330_v6  ;;  %2288 = vmatpush2.bf16.msra.mxu0 %v3576_v54  ;;  %v1377_v11 = vpack.c.bf16 %v1371_v5, %v1367_v7  ;;  %v3645_v54 = vld [vmem:[#allocation10 + $0x48] sm:$0xff]   ;;  %v3648_v5 = vld [vmem:[#allocation10] sm:$0xff]   ;;  %v3649_v6 = vld [vmem:[#allocation10 + $0xf8] sm:$0xff]  }
 0x245   :  { %2289 = vmatprep.subr.bf16.mxu0 %v3584_v4  ;;  %v3646_v3 = vld [vmem:[#allocation10 + $0x8] sm:$0xff]   ;;  %v3647_v4 = vld [vmem:[#allocation10 + $0x40] sm:$0xff]   ;;  %v3650_v7 = vld [vmem:[#allocation10 + $0xb8] sm:$0xff]  }
 0x246   :  { %v1378_v12 = vpack.c.bf16 %v1373_v9, %v1369_v60  ;;  %v3991_v15 = vmax.bf16 %v3857_v0, %v1377_v11  ;;  %v3651_v8 = vld [vmem:[#allocation10 + $0xf0] sm:$0xff]   ;;  %v3653_v9 = vld [vmem:[#allocation10 + $0xe8] sm:$0xff]   ;;  %v3655_v11 = vld [vmem:[#allocation10 + $0xe0] sm:$0xff]  }
 0x247   :  { %v3652_v60 = vld [vmem:[#allocation10 + $0xb0] sm:$0xff]  }
 0x248   :  { %2290 = vmatpush2.bf16.msra.mxu0 %v3582_v10  ;;  %v1382_v13 = vmax.bf16 %v3857_v0, %v1378_v12  ;;  %v3654_v10 = vld [vmem:[#allocation10 + $0xa8] sm:$0xff]   ;;  %v3656_v12 = vld [vmem:[#allocation10 + $0xa0] sm:$0xff]  }
 0x249   :  { %3140 = vmatprep.subr.bf16.mxu0 %v3633_v22 }
 0x24a   :  { %2248 = vmatprep.mubr.bf16.mxu1 %v1382_v13 }
 0x24b   :  { %2249 = vmatmul.mubr.bf16.vlgmr.msra.gmra.mxu1 %v3991_v15  ;;  %2292 = vmatmul.mubr.bf16.vlgmr.msra.gmra.mxu0 %v3978_v19  ;;  %v3637_v19 = vld [vmem:[#allocation10 + $0x68] sm:$0xff]  }
 0x24c   :  { %2303 = vmatpush1.bf16.msra.mxu1 %v3585_v14  ;;  %2334 = vmatprep.mubr.bf16.mxu1 %v1382_v13  ;;  %v3657_v13 = vld [vmem:[#allocation10 + $0xd8] sm:$0xff]  }
 0x24d   :  { %2304 = vmatprep.subr.bf16.mxu1 %v3590_v16  ;;  %3141 = vmatpush3.bf16.msra.mxu0 %v3634_v23  ;;  %v3658_v14 = vld [vmem:[#allocation10 + $0x98] sm:$0xff]   ;;  %v3660_v16 = vld [vmem:[#allocation10 + $0x90] sm:$0xff]  }
 0x24e   :  { %3142 = vmatprep.subr.bf16.mxu0 %v3635_v24  ;;  %v1511_v24 = vld [vmem:[%s4040_s5] sm:$0xf] }
 0x250   :  { %2305 = vmatpush1.bf16.msra.mxu1 %v3588_v17  ;;  %v3661_v17 = vld [vmem:[#allocation10 + $0xc8] sm:$0xff]  }
 0x251   :  { %2306 = vmatprep.subr.bf16.mxu1 %v3593_v18  ;;  %3143 = vmatpush3.bf16.msra.mxu0 %v3636_v27  ;;  %v3662_v18 = vld [vmem:[#allocation10 + $0x88] sm:$0xff]  }
 0x252   :  { %3144 = vmatprep.subr.bf16.mxu0 %v3637_v19  ;;  %v1520_v19 = vrot.slane %v1511_v24, %v549_v61 }
 0x254   :  { %2307 = vmatpush1.bf16.msra.mxu1 %v3591_v20  ;;  %v3663_v20 = vld [vmem:[#allocation10 + $0xc0] sm:$0xff]  }
 0x255   :  { %2308 = vmatprep.subr.bf16.mxu1 %v3596_v21  ;;  %3145 = vmatpush3.bf16.msra.mxu0 %v3638_v30  ;;  %v3664_v21 = vld [vmem:[#allocation10 + $0x80] sm:$0xff]  }
 0x256   :  { %3146 = vmatprep.subr.bf16.mxu0 %v3639_v31 }
 0x258   :  { %2309 = vmatpush1.bf16.msra.mxu1 %v3594_v25 }
 0x259   :  { %2310 = vmatprep.subr.bf16.mxu1 %v3599_v26  ;;  %3147 = vmatpush3.bf16.msra.mxu0 %v3640_v34  ;;  %v1516_v26 = vrot.slane %v1511_v24, %v545_v59 }
 0x25a   :  { %3148 = vmatprep.subr.bf16.mxu0 %v3641_v35 }
 0x25c   :  { %2311 = vmatpush1.bf16.msra.mxu1 %v3597_v28 }
 0x25d   :  { %2312 = vmatprep.subr.bf16.mxu1 %v3602_v29  ;;  %3149 = vmatpush3.bf16.msra.mxu0 %v3642_v38 }
 0x25e   :  { %3150 = vmatprep.subr.bf16.mxu0 %v3643_v2 }
 0x260   :  { %2313 = vmatpush1.bf16.msra.mxu1 %v3600_v32 }
 0x261   :  { %2314 = vmatprep.subr.bf16.mxu1 %v3605_v33  ;;  %3151 = vmatpush3.bf16.msra.mxu0 %v3644_v53 }
 0x262   :  { %3152 = vmatprep.subr.bf16.mxu0 %v3645_v54 }
 0x264   :  { %2315 = vmatpush1.bf16.msra.mxu1 %v3603_v36 }
 0x265   :  { %2316 = vmatprep.subr.bf16.mxu1 %v3608_v37  ;;  %3153 = vmatpush3.bf16.msra.mxu0 %v3646_v3 }
 0x266   :  { %3154 = vmatprep.subr.bf16.mxu0 %v3647_v4 }
 0x268   :  { %2317 = vmatpush1.bf16.msra.mxu1 %v3606_v39 }
 0x269   :  { %2318 = vmatprep.subr.bf16.mxu1 %v3611_v40  ;;  %3155 = vmatpush3.bf16.msra.mxu0 %v3648_v5 }
 0x26c   :  { %2319 = vmatpush2.bf16.msra.mxu1 %v3609_v41 }
 0x26d   :  { %2320 = vmatprep.subr.bf16.mxu1 %v3614_v42 }
 0x270   :  { %2321 = vmatpush2.bf16.msra.mxu1 %v3612_v44 }
 0x271   :  { %2322 = vmatprep.subr.bf16.mxu1 %v3617_v46 }
 0x274   :  { %2323 = vmatpush2.bf16.msra.mxu1 %v3615_v47  ;;  %v1524_v47 = vrot.slane %v1511_v24, %v553_v43 }
 0x275   :  { %2324 = vmatprep.subr.bf16.mxu1 %v3620_v48 }
 0x278   :  { %2325 = vmatpush2.bf16.msra.mxu1 %v3618_v49  ;;  %v1528_v49 = vrot.slane %v1511_v24, %v557_v45 }
 0x279   :  { %2326 = vmatprep.subr.bf16.mxu1 %v3623_v50 }
 0x27c   :  { %2327 = vmatpush2.bf16.msra.mxu1 %v3621_v51 }
 0x27d   :  { %2328 = vmatprep.subr.bf16.mxu1 %v3626_v52 }
 0x280   :  { %2329 = vmatpush2.bf16.msra.mxu1 %v3624_v55 }
 0x281   :  { %2330 = vmatprep.subr.bf16.mxu1 %v3629_v56 }
 0x284   :  { %2331 = vmatpush2.bf16.msra.mxu1 %v3627_v62 }
 0x285   :  { %2332 = vmatprep.subr.bf16.mxu1 %v3632_v63 }
 0x288   :  { %2333 = vmatpush2.bf16.msra.mxu1 %v3630_v1 }
 0x289   :  { %3162 = vmatprep.subr.bf16.mxu1 %v3649_v6 }
 0x28b   :  { %2335 = vmatmul.mubr.bf16.vlgmr.msra.gmra.mxu1 %v3991_v15  ;;  %v3659_v15 = vld [vmem:[#allocation10 + $0xd0] sm:$0xff]  }
 0x28c   :  { %3163 = vmatpush3.bf16.msra.mxu1 %v3650_v7 }
 0x28d   :  { %3164 = vmatprep.subr.bf16.mxu1 %v3651_v8 }
 0x290   :  { %3165 = vmatpush3.bf16.msra.mxu1 %v3652_v60  ;;  %v3103_v60 = vld [vmem:[%s4042_s7] ss:$0 sm:$0xff]  ;;  %s3858_s7 = smov [#allocation13]  }
 0x291   :  { %3166 = vmatprep.subr.bf16.mxu1 %v3653_v9  ;;  %s2783_s1 = sshll.u32 %s3858_s7, 4  ;;  %s2784_s1 = int_to_ptr.vmem [resolvable:$true] %s2783_s1 }
 0x292   :  { %s3793_s27 = scalar_lea.vmem %s2784_s1, 256  ;;  %p3798_p3 = scmp.lt.s32.totalorder %s2784_s1, %s2784_s1 }
 0x293   :  { %p3794_p2 = scmp.ne.s32.totalorder %s2784_s1, %s3793_s27  ;;  %p3799_p4 = scmp.lt.s32.totalorder %s3793_s27, %s3793_s27 }
 0x294   :  { %3167 = vmatpush3.bf16.msra.mxu1 %v3654_v10 }
 0x295   :  { %3168 = vmatprep.subr.bf16.mxu1 %v3655_v11  ;;  %p3800_p5 = por %p3799_p4, %p3798_p3 }
 0x297   :  { %p3801_p6 = pnand %p3800_p5, %p3794_p2 }
 0x298   :  { %3169 = vmatpush3.bf16.msra.mxu1 %v3656_v12  ;;  %v4015_v12 = vand.u32 127, %v543_v57 }
 0x299   :  { %3170 = vmatprep.subr.bf16.mxu1 %v3657_v13 }
 0x29a   :  { %vm2704_vm0 = vcmp.lt.s32.totalorder %v4015_v12, 8 }
 0x29c   :  { %3171 = vmatpush3.bf16.msra.mxu1 %v3658_v14 }
 0x29d   :  { %3172 = vmatprep.subr.bf16.mxu1 %v3659_v15 }
 0x2a0   :  { %3173 = vmatpush3.bf16.msra.mxu1 %v3660_v16 }
 0x2a1   :  { %3174 = vmatprep.subr.bf16.mxu1 %v3661_v17 }
 0x2a4   :  { %3175 = vmatpush3.bf16.msra.mxu1 %v3662_v18 }
 0x2a5   :  { %3176 = vmatprep.subr.bf16.mxu1 %v3663_v20 }
 0x2a8   :  { %3177 = vmatpush3.bf16.msra.mxu1 %v3664_v21 }
 0x2cb   :  { %v2207_v22 = vpop.f32.mrf.mxu0 }
 0x2cc   :  { %v2208_v31 = vadd.f32 %v2207_v22, %v1516_v26  ;;  %v2721_v22 = vld [vmem:[#allocation11] sm:$0xff] }
 0x2cd   :  { %v2209_v23 = vpop.f32.mrf.mxu0 }
 0x2ce   :  { %v2210_v33 = vadd.f32 %v2209_v23, %v1520_v19 }
 0x2cf   :  { %v2211_v25 = vpop.f32.mrf.mxu0 }
 0x2d0   :  { %v2212_v30 = vadd.f32 %v2211_v25, %v1516_v26 }
 0x2d1   :  { %v2213_v28 = vpop.f32.mrf.mxu0 }
 0x2d2   :  { %v2214_v34 = vadd.f32 %v2213_v28, %v1520_v19  ;;  %v2722_v28 = vld [vmem:[#allocation11 + $0x8] sm:$0xff] }
 0x30b   :  { %v2250_v27 = vpop.f32.mrf.mxu1  ;;  %v2293_v61 = vpop.f32.mrf.mxu0 }
 0x30c   :  { %v2251_v36 = vadd.f32 %v2250_v27, %v2208_v31  ;;  %v2294_v55 = vadd.f32 %v2293_v61, %v1524_v47 }
 0x30d   :  { %v2252_v29 = vpop.f32.mrf.mxu1  ;;  %v2295_v44 = vpop.f32.mrf.mxu0 }
 0x30e   :  { %v2253_v38 = vadd.f32 %v2252_v29, %v2210_v33  ;;  %v2296_v62 = vadd.f32 %v2295_v44, %v1528_v49  ;;  %v2735_v33 = vsub.s32 127, %v4015_v12 }
 0x30f   :  { %v2254_v32 = vpop.f32.mrf.mxu1  ;;  %v2297_v46 = vpop.f32.mrf.mxu0 }
 0x310   :  { %v2255_v35 = vadd.f32 %v2254_v32, %v2212_v30  ;;  %v2298_v52 = vadd.f32 %v2297_v46, %v1524_v47 }
 0x311   :  { %v2256_v37 = vpop.f32.mrf.mxu1  ;;  %v2299_v50 = vpop.f32.mrf.mxu0 }
 0x312   :  { %v2257_v39 = vadd.f32 %v2256_v37, %v2214_v34  ;;  %v2345_v40 = vpack.c.bf16 %v2255_v35, %v2251_v36  ;;  %v2300_v63 = vadd.f32 %v2299_v50, %v1528_v49 }
 0x314   :  { %v2346_v41 = vpack.c.bf16 %v2257_v39, %v2253_v38  ;;  %v2349_v42 = vmax.bf16 %v3857_v0, %v2345_v40 }
 0x316   :  { %v2350_v59 = vmax.bf16 %v3857_v0, %v2346_v41 }
 0x318   :  { %2648 = vmatprep.mubr.bf16.mxu0 %v2350_v59 }
 0x319   :  { %2649 = vmatmul.mubr.bf16.vlgmr.msra.gmra.mxu0 %v2349_v42 }
 0x34b   :  { %v2336_v48 = vpop.f32.mrf.mxu1 }
 0x34c   :  { %v2337_v2 = vadd.f32 %v2336_v48, %v2294_v55 }
 0x34d   :  { %v2338_v51 = vpop.f32.mrf.mxu1 }
 0x34e   :  { %v2339_v54 = vadd.f32 %v2338_v51, %v2296_v62 }
 0x34f   :  { %v2340_v56 = vpop.f32.mrf.mxu1 }
 0x350   :  { %v2341_v1 = vadd.f32 %v2340_v56, %v2298_v52 }
 0x351   :  { %v2342_v53 = vpop.f32.mrf.mxu1 }
 0x352   :  { %v2343_v3 = vadd.f32 %v2342_v53, %v2300_v63  ;;  %v2347_v4 = vpack.c.bf16 %v2341_v1, %v2337_v2 }
 0x354   :  { %v2348_v5 = vpack.c.bf16 %v2343_v3, %v2339_v54  ;;  %v2351_v6 = vmax.bf16 %v3857_v0, %v2347_v4 }
 0x356   :  { %v2352_v43 = vmax.bf16 %v3857_v0, %v2348_v5 }
 0x358   :  { %2689 = vmatprep.mubr.bf16.mxu1 %v2352_v43 }
 0x359   :  { %2690 = vmatmul.mubr.bf16.vlgmr.msra.gmra.mxu1 %v2351_v6 }
 0x3d9   :  { %v3156_v58 = vpop.f32.mrf.mxu0 }
 0x3db   :  { %v3157_v45 = vpop.f32.mrf.mxu0 }
 0x3dc   :  { %v3158_v8 = vadd.f32 %v3157_v45, %v3156_v58 }
 0x3dd   :  { %v3159_v7 = vpop.f32.mrf.mxu0 }
 0x3de   :  { %v2651_v13 = vadd.f32 %v3158_v8, %v3103_v60 }
 0x3df   :  { %v3160_v9 = vpop.f32.mrf.mxu0 }
 0x3e0   :  { %v3161_v14 = vadd.f32 %v3160_v9, %v3159_v7 }
 0x3e2   :  { %v2654_v20 = vadd.f32 %v3161_v14, %v3103_v60 }
 0x419   :  { %v3178_v10 = vpop.f32.mrf.mxu1 }
 0x41b   :  { %v3179_v11 = vpop.f32.mrf.mxu1 }
 0x41c   :  { %v3180_v15 = vadd.f32 %v3179_v11, %v3178_v10 }
 0x41d   :  { %v3181_v16 = vpop.f32.mrf.mxu1 }
 0x41e   :  { %v2692_v17 = vadd.f32 %v3180_v15, %v2651_v13 }
 0x41f   :  { %v3182_v18 = vpop.f32.mrf.mxu1 }
 0x420   :  { %v3136_v21 = vclamps-f32 %v2692_v17, 10.0  ;;  %v3183_v23 = vadd.f32 %v3182_v18, %v3181_v16 }
 0x422   :  { %v2705_v24 = vsel %vm2704_vm0, %v3136_v21, -1e+09  ;;  %v2695_v25 = vadd.f32 %v3183_v23, %v2654_v20 }
 0x423   :  { %v2707_v26 = vmul.f32 1.442695, %v2705_v24  ;;  %v2723_v27 = vadd.f32 %v2721_v22, %v2705_v24 }
 0x424   :  { %v3137_v19 = vclamps-f32 %v2695_v25, 10.0 }
 0x425   :  { %3665 = vpow2.f32 %v2707_v26  ;;  %vm2727_vm1 = vcmp.lt.s32.totalorder %v2723_v27, 0 }
 0x426   :  { %v2706_v57 = vsel %vm2704_vm0, %v3137_v19, -1e+09  ;;  %v2729_v29 = vsel %vm2727_vm1, 2147483647, %v3857_v0 }
 0x427   :  { %v2709_v30 = vmul.f32 1.442695, %v2706_v57  ;;  %v2724_v31 = vadd.f32 %v2722_v28, %v2706_v57  ;;  %v2731_v32 = vxor.u32 %v2729_v29, %v2723_v27 }
 0x429   :  { %3667 = vpow2.f32 %v2709_v30  ;;  %vm2728_vm2 = vcmp.lt.s32.totalorder %v2724_v31, 0  ;;  %v2733_v34 = vand.u32 4294967168, %v2731_v32 }
 0x42a   :  { %v2730_v35 = vsel %vm2728_vm2, 2147483647, %v3857_v0 }
 0x42b   :  { %v2736_v36 = vor.u32 %v2735_v33, %v2733_v34  ;;  %v2732_v37 = vxor.u32 %v2730_v35, %v2724_v31 }
 0x42d   :  { %v2739_v38 = vshra.s32 %v2736_v36, 16  ;;  %v2734_v39 = vand.u32 4294967168, %v2732_v37  ;;  %v2738_v46 = vand.u32 65535, %v2736_v36 }
 0x42f   :  { %v2741_v40 = vcvt.s32.f32 %v2739_v38  ;;  %v2737_v41 = vor.u32 %v2735_v33, %v2734_v39  ;;  %v2740_v48 = vcvt.s32.f32 %v2738_v46 }
 0x431   :  { %2742 = vmax.xlane.f32.xlu0 %v2741_v40  ;;  %v2753_v59 = vshra.s32 %v2737_v41, 16  ;;  %v2752_v49 = vand.u32 65535, %v2737_v41 }
 0x432   :  { %v3666_v42 = vpop.eup %3665 }
 0x433   :  { %2711 = vadd.xlane.f32.xlu1 %v3666_v42  ;;  %v2755_v61 = vcvt.s32.f32 %v2753_v59  ;;  %v2754_v52 = vcvt.s32.f32 %v2752_v49 }
 0x435   :  { %2756 = vmax.xlane.f32.xlu0 %v2755_v61 }
 0x436   :  { %v3668_v44 = vpop.eup %3667 }
 0x437   :  { %2713 = vadd.xlane.f32.xlu1 %v3668_v44 }
 0x4ba   :  { %v2743_v47 = vpop.xlane.xlu0 %2742 }
 0x4bb   :  { %vm2744_vm3 = vcmp.eq.f32.partialorder %v2741_v40, %v2743_v47 }
 0x4bc   :  { %v2712_v0 = vpop.xlane.xlu1 %2711  ;;  %v2745_v50 = vsel %vm2744_vm3, %v2740_v48, -inf }
 0x4bd   :  { %3669 = vrcp.f32 %v2712_v0  ;;  %2746 = vmax.xlane.f32.xlu0 %v2745_v50 }
 0x4be   :  { %v2757_v51 = vpop.xlane.xlu0 %2756 }
 0x4bf   :  { %vm2758_vm4 = vcmp.eq.f32.partialorder %v2755_v61, %v2757_v51 }
 0x4c0   :  { %v2714_v55 = vpop.xlane.xlu1 %2713  ;;  %v2759_v56 = vsel %vm2758_vm4, %v2754_v52, -inf }
 0x4c1   :  { %3671 = vrcp.f32 %v2714_v55  ;;  %2760 = vmax.xlane.f32.xlu1 %v2759_v56 }
 0x4ca   :  { %v3670_v62 = vpop.eup %3669 }
 0x4cb   :  { %v2717_v63 = vmul.f32 %v3670_v62, %v3666_v42 }
 0x4cd   :  { %2719 = vst [vmem:[#allocation13] sm:$0xff] %v2717_v63 }
 0x4ce   :  { %v3672_v1 = vpop.eup %3671 }
 0x4cf   :  { %v2718_v2 = vmul.f32 %v3672_v1, %v3668_v44 }
 0x4d1   :  { %2720 = vst [vmem:[#allocation13 + $0x8] sm:$0xff] %v2718_v2 }
 0x4d2   :  { %3804 = shalt.err (!%p3801_p6)
}
 0x4d3   :  { %2789 = dma.vmem_to_hbm [thread:$0]  %s2784_s1, 256, %s4044_s9, [#allocation4], %s3855_s2, %s3855_s2, %s3856_s16   ;;  %v2749_v53 = vcvt.f32.s32 %v2743_v47  ;;  %v2763_v4 = vcvt.f32.s32 %v2757_v51  ;;  %v3859_v10 = vmov 0.0  }
 0x4d4   :  { %s3860_s30 = smov [#allocation14]  }
 0x4d5   :  { %v2750_v3 = vshll.u32 %v2749_v53, 16  ;;  %v2764_v58 = vshll.u32 %v2763_v4, 16  ;;  %s2795_s11 = sshll.u32 %s3860_s30, 4  ;;  %s2796_s11 = int_to_ptr.vmem [resolvable:$true] %s2795_s11 }
 0x4d6   :  { %s3813_s9 = scalar_lea.vmem %s2796_s11, 256  ;;  %p3818_p8 = scmp.lt.s32.totalorder %s2796_s11, %s2796_s11 }
 0x4d7   :  { %p3814_p7 = scmp.ne.s32.totalorder %s2796_s11, %s3813_s9  ;;  %p3819_p9 = scmp.lt.s32.totalorder %s3813_s9, %s3813_s9 }
 0x4d9   :  { %p3820_p10 = por %p3819_p9, %p3818_p8 }
 0x4db   :  { %p3821_p11 = pnand %p3820_p10, %p3814_p7 }
 0x546   :  { %v2747_v54 = vpop.xlane.xlu0 %2746 }
 0x547   :  { %v2748_v5 = vcvt.f32.s32 %v2747_v54 }
 0x549   :  { %v2751_v43 = vadd.s32 %v2750_v3, %v2748_v5 }
 0x54a   :  { %v2761_v6 = vpop.xlane.xlu1 %2760 }
 0x54b   :  { %v2766_v45 = vand.u32 127, %v2751_v43  ;;  %v2762_v7 = vcvt.f32.s32 %v2761_v6 }
 0x54d   :  { %v2768_v8 = vsub.s32 127, %v2766_v45  ;;  %v2765_v60 = vadd.s32 %v2764_v58, %v2762_v7 }
 0x54f   :  { %vm2770_vm5 = vcmp.eq.s32.totalorder %v4015_v12, %v2768_v8  ;;  %v2767_v9 = vand.u32 127, %v2765_v60 }
 0x550   :  { %v3138_v11 = vsel %vm2770_vm5, 1.0, %v3859_v10 }
 0x551   :  { %v2769_v13 = vsub.s32 127, %v2767_v9  ;;  %2776 = vst [vmem:[#allocation14] sm:$0xff] %v3138_v11 }
 0x553   :  { %vm2771_vm6 = vcmp.eq.s32.totalorder %v4015_v12, %v2769_v13 }
 0x554   :  { %v3139_v14 = vsel %vm2771_vm6, 1.0, %v3859_v10 }
 0x555   :  { %2777 = vst [vmem:[#allocation14 + $0x8] sm:$0xff] %v3139_v14 }
 0x556   :  { %3824 = shalt.err (!%p3821_p11)
}
 0x557   :  { %2801 = dma.vmem_to_hbm [thread:$0]  %s2796_s11, 256, %s4045_s10, [#allocation15], %s3855_s2, %s3855_s2, %s3856_s16  }
 0x558   :  { %3841 = dma.done.wait [#allocation4], 256  }
 0x559   :  { %3842 = vsyncadd [#allocation4], 4294967040 }
 0x55a   :  { %3843 = dma.done.wait [#allocation15], 256  }
 0x55b   :  { %3844 = vsyncadd [#allocation15], 4294967040 }
 0x55c   :  { %2808 = vsyncpa [#allocation3], 1 }
 0x55d   :  { %2809 = vsyncpa [#allocation6], 1 }
 0x55e   :  { %2810 = vsyncpa [#allocation9], 1 }
 0x55f   :  { %2811 = vsyncpa [#allocation12], 1 }
 0x560   :  { %2812 = vsyncpa [#allocation4], 1 }
 0x561   :  { %2813 = vsyncpa [#allocation15], 1 }

</bundles_post_ra>
